<compile_context>
chip_gen: v7x
topology: tpu7x:2x2x1
jax: 0.10.0
libtpu: 0.0.40
codegen_flags: <defaults>
</compile_context>

<pallas_src>
import math
import numpy as np
import jax
import jax.numpy as jnp
from jax.experimental import pallas as pl
from jax.experimental.pallas import tpu as pltpu


def _layernorm(x, g, b, eps=1e-5):
    mu = jnp.mean(x, axis=-1, keepdims=True)
    var = jnp.mean((x - mu) ** 2, axis=-1, keepdims=True)
    return (x - mu) * jax.lax.rsqrt(var + eps) * g + b


def make_block_sync_kernel(n_head, head_size):
    H, D = n_head, head_size
    scale = 1.0 / math.sqrt(D)

    def kernel(x_ref, ln1_g_ref, ln1_b_ref, wqkv_ref, wp_ref, bp_ref,
               ln2_g_ref, ln2_b_ref, w1_ref, b1_ref, w2_ref, b2_ref, o_ref):
        TB, S, L = x_ref.shape                      # static block shape
        R = TB * S
        x = x_ref[...].reshape(R, L)                # leading-dim merge: free

        # ---- LayerNorm1 + fused QKV projection (one (R,L)@(L,3L) matmul) ----
        h1 = _layernorm(x, ln1_g_ref[...], ln1_b_ref[...])
        qkv = jnp.dot(h1, wqkv_ref[...], preferred_element_type=jnp.float32)  # (R, 3L)
        q = qkv[:, 0 * L:1 * L].reshape(TB, S, L)
        k = qkv[:, 1 * L:2 * L].reshape(TB, S, L)
        v = qkv[:, 2 * L:3 * L].reshape(TB, S, L)

        # ---- attention, batched over (head, slab): batch dim = H*TB ----
        # Heads are gathered into the leading (untiled) batch dim via lane
        # slices + leading-axis concat; the contraction uses the trailing D
        # dims of q/k directly, so there are no explicit kh.T XLU transposes.
        qh = jnp.concatenate([q[:, :, h * D:(h + 1) * D] for h in range(H)], axis=0)
        kh = jnp.concatenate([k[:, :, h * D:(h + 1) * D] for h in range(H)], axis=0)
        vh = jnp.concatenate([v[:, :, h * D:(h + 1) * D] for h in range(H)], axis=0)

        wei = jnp.einsum("bqd,bkd->bqk", qh, kh,
                         preferred_element_type=jnp.float32) * scale     # (H*TB, S, S)
        wei = wei - jnp.max(wei, axis=-1, keepdims=True)
        e = jnp.exp(wei)
        # EUP approximate reciprocal: denominator multiply instead of VALU divide.
        p = e * pl.reciprocal(jnp.sum(e, axis=-1, keepdims=True), approx=True)
        ctx = jnp.einsum("bqk,bkd->bqd", p, vh,
                         preferred_element_type=jnp.float32)              # (H*TB, S, D)

        # Undo head batching with a single lane-axis concat (head-major order,
        # matching torch.cat([head_0, ..., head_{H-1}], dim=-1)).
        att = jnp.concatenate([ctx[h * TB:(h + 1) * TB] for h in range(H)], axis=-1)
        att = att.reshape(R, L)

        sa = jnp.dot(att, wp_ref[...], preferred_element_type=jnp.float32) + bp_ref[...]
        x1 = x + sa

        # ---- LayerNorm2 + MLP (all rows at once) ----
        h2 = _layernorm(x1, ln2_g_ref[...], ln2_b_ref[...])
        f = jnp.dot(h2, w1_ref[...], preferred_element_type=jnp.float32) + b1_ref[...]
        f = jnp.maximum(f, 0.0)
        f = jnp.dot(f, w2_ref[...], preferred_element_type=jnp.float32) + b2_ref[...]

        o_ref[...] = (x1 + f).reshape(TB, S, L)

    return kernel


def _default_grid_steps(n_slabs):
    """v7x has 2 TensorCores/chip -> keep >=2 parallel grid steps so both get work.
    Single-TC v5e/v6e -> collapse the grid fully (one step, no weight revisits)."""
    try:
        kind = jax.devices()[0].device_kind.lower()
    except Exception:
        kind = ""
    n_cores = 2 if "v7" in kind else 1
    return max(1, min(n_cores, n_slabs))


def block_sync_forward(x, p, n_head, grid_steps=None):
    """x: (b, c, s, L) float32. p: dict of parameters in PyTorch (out, in) layout."""
    b, c, s, L = x.shape
    D = L // n_head
    N = b * c
    if grid_steps is None:
        grid_steps = _default_grid_steps(N)
    G = max(1, min(grid_steps, N))
    TB = pl.cdiv(N, G)                 # slabs per grid step
    Npad = TB * G

    xf = x.reshape(N, s, L)
    if Npad != N:
        xf = jnp.pad(xf, ((0, Npad - N), (0, 0), (0, 0)))

    # Kernel-layout parameters: weights pre-transposed to (in, out) so the kernel
    # computes x @ W; Q/K/V fused into one (L, 3L) weight; 1-D vectors -> (1, K).
    wqkv = jnp.concatenate([p["wq"].T, p["wk"].T, p["wv"].T], axis=1)   # (L, 3L)
    kparams = (
        p["ln1_g"].reshape(1, L), p["ln1_b"].reshape(1, L),
        wqkv,
        p["wp"].T, p["bp"].reshape(1, L),
        p["ln2_g"].reshape(1, L), p["ln2_b"].reshape(1, L),
        p["w1"].T, p["b1"].reshape(1, 4 * L),
        p["w2"].T, p["b2"].reshape(1, L),
    )

    in_specs = [
        pl.BlockSpec((TB, s, L), lambda i: (i, 0, 0)),       # x: TB slabs per step
        pl.BlockSpec((1, L), lambda i: (0, 0)),              # ln1 gamma
        pl.BlockSpec((1, L), lambda i: (0, 0)),              # ln1 beta
        pl.BlockSpec((L, 3 * L), lambda i: (0, 0)),          # fused Wqkv^T
        pl.BlockSpec((L, L), lambda i: (0, 0)),              # Wproj^T
        pl.BlockSpec((1, L), lambda i: (0, 0)),              # bproj
        pl.BlockSpec((1, L), lambda i: (0, 0)),              # ln2 gamma
        pl.BlockSpec((1, L), lambda i: (0, 0)),              # ln2 beta
        pl.BlockSpec((L, 4 * L), lambda i: (0, 0)),          # W1^T
        pl.BlockSpec((1, 4 * L), lambda i: (0, 0)),          # b1
        pl.BlockSpec((4 * L, L), lambda i: (0, 0)),          # W2^T
        pl.BlockSpec((1, L), lambda i: (0, 0)),              # b2
    ]

    # Advisory cost estimate (matmuls + attention flops, exp count, HBM traffic).
    R = Npad * s
    mm_flops = 2 * R * L * (3 * L + L + 4 * L + 4 * L)
    attn_flops = 4 * Npad * n_head * s * s * D
    cost = pl.CostEstimate(
        flops=int(mm_flops + attn_flops),
        transcendentals=int(Npad * n_head * s * s),
        bytes_accessed=int(4 * (2 * Npad * s * L + 12 * L * L + 10 * L)),
    )

    # NOTE: at these shapes everything (weights ~50 KiB + activations ~kB/slab)
    # fits far under every generation's scoped-VMEM default, so no explicit
    # vmem_limit_bytes is needed; at production sizes re-derive TB against
    # v7x's 64 MiB VMEM and set vmem_limit_bytes explicitly.
    out = pl.pallas_call(
        make_block_sync_kernel(n_head, D),
        grid=(G,),
        in_specs=in_specs,
        out_specs=pl.BlockSpec((TB, s, L), lambda i: (i, 0, 0)),
        out_shape=jax.ShapeDtypeStruct((Npad, s, L), jnp.float32),
        compiler_params=pltpu.CompilerParams(dimension_semantics=("parallel",)),
        cost_estimate=cost,
    )(xf, *kparams)

    return out[:N].reshape(b, c, s, L)


def init_params(key, L, n_head):
    """Deterministic synthetic parameters mirroring nn.Linear / nn.LayerNorm shapes."""
    D = L // n_head
    keys = jax.random.split(key, 9)

    def lin(k, fan_in, shape):
        bound = 1.0 / math.sqrt(fan_in)
        return jax.random.uniform(k, shape, jnp.float32, -bound, bound)

    return dict(
        ln1_g=jnp.ones((L,), jnp.float32), ln1_b=jnp.zeros((L,), jnp.float32),
        # per-head key/query/value (D, L) weights, concatenated head-major -> (L, L)
        wq=lin(keys[0], L, (n_head * D, L)),
        wk=lin(keys[1], L, (n_head * D, L)),
        wv=lin(keys[2], L, (n_head * D, L)),
        wp=lin(keys[3], L, (L, L)), bp=lin(keys[4], L, (L,)),
        ln2_g=jnp.ones((L,), jnp.float32), ln2_b=jnp.zeros((L,), jnp.float32),
        w1=lin(keys[5], L, (4 * L, L)), b1=lin(keys[6], L, (4 * L,)),
        w2=lin(keys[7], 4 * L, (L, 4 * L)), b2=lin(keys[8], 4 * L, (L,)),
    )


def reference_forward(x, p, n_head):
    """Plain-JAX reference of the same math (dropout = identity, f32, exact softmax)."""
    L = x.shape[-1]
    D = L // n_head
    h1 = _layernorm(x, p["ln1_g"], p["ln1_b"])
    q = h1 @ p["wq"].T
    k = h1 @ p["wk"].T
    v = h1 @ p["wv"].T
    outs = []
    for h in range(n_head):
        sl = slice(h * D, (h + 1) * D)
        qh, kh, vh = q[..., sl], k[..., sl], v[..., sl]
        wei = jnp.einsum("bcqd,bckd->bcqk", qh, kh) / math.sqrt(D)
        wei = jax.nn.softmax(wei, axis=-1)
        outs.append(jnp.einsum("bcqk,bckd->bcqd", wei, vh))
    att = jnp.concatenate(outs, axis=-1)
    x1 = x + att @ p["wp"].T + p["bp"]
    h2 = _layernorm(x1, p["ln2_g"], p["ln2_b"])
    f = jnp.maximum(h2 @ p["w1"].T + p["b1"], 0.0) @ p["w2"].T + p["b2"]
    return x1 + f


if __name__ == "__main__":
    # Small shapes consistent with the module: x is (b, c, s, L), L % n_head == 0.
    b, c, s, L, n_head = 2, 4, 8, 32, 4

    key = jax.random.PRNGKey(0)
    kx, kp = jax.random.split(key)
    x = jax.random.normal(kx, (b, c, s, L), jnp.float32)
    params = init_params(kp, L, n_head)

    out = block_sync_forward(x, params, n_head)
    out = jax.block_until_ready(out)

    ref = reference_forward(x, params, n_head)
    assert out.shape == (b, c, s, L)
    # Tolerance widened from 1e-4 to 2e-3 solely to accommodate the EUP
    # approximate reciprocal in the softmax denominator (perf-review item);
    # all other math is exact f32.
    np.testing.assert_allclose(np.asarray(out), np.asarray(ref), rtol=2e-3, atol=2e-3)

    print("KERNEL_OK")
</pallas_src>

<mosaic_0001>
module attributes {stable_mosaic.version = 11 : i64} {
  func.func @kernel(%arg0: i32, %arg1: memref<8x8x32xf32, #tpu.memory_space<vmem>>, %arg2: memref<1x32xf32, #tpu.memory_space<vmem>>, %arg3: memref<1x32xf32, #tpu.memory_space<vmem>>, %arg4: memref<32x96xf32, #tpu.memory_space<vmem>>, %arg5: memref<32x32xf32, #tpu.memory_space<vmem>>, %arg6: memref<1x32xf32, #tpu.memory_space<vmem>>, %arg7: memref<1x32xf32, #tpu.memory_space<vmem>>, %arg8: memref<1x32xf32, #tpu.memory_space<vmem>>, %arg9: memref<32x128xf32, #tpu.memory_space<vmem>>, %arg10: memref<1x128xf32, #tpu.memory_space<vmem>>, %arg11: memref<128x32xf32, #tpu.memory_space<vmem>>, %arg12: memref<1x32xf32, #tpu.memory_space<vmem>>, %arg13: memref<8x8x32xf32, #tpu.memory_space<vmem>>) attributes {dimension_semantics = [#tpu.dimension_semantics<parallel>], iteration_bounds = array<i64: 1>, scalar_prefetch = 0 : i64, scratch_operands = 0 : i64, tpu.core_type = #tpu.core_type<tc>, window_params = [{transform_indices = @transform_0, window_bounds = array<i64: 8, 8, 32>}, {pipeline_mode = #tpu.pipeline_mode<synchronous>, transform_indices = @transform_1, window_bounds = array<i64: 1, 32>}, {pipeline_mode = #tpu.pipeline_mode<synchronous>, transform_indices = @transform_2, window_bounds = array<i64: 1, 32>}, {pipeline_mode = #tpu.pipeline_mode<synchronous>, transform_indices = @transform_3, window_bounds = array<i64: 32, 96>}, {pipeline_mode = #tpu.pipeline_mode<synchronous>, transform_indices = @transform_4, window_bounds = array<i64: 32, 32>}, {pipeline_mode = #tpu.pipeline_mode<synchronous>, transform_indices = @transform_5, window_bounds = array<i64: 1, 32>}, {pipeline_mode = #tpu.pipeline_mode<synchronous>, transform_indices = @transform_6, window_bounds = array<i64: 1, 32>}, {pipeline_mode = #tpu.pipeline_mode<synchronous>, transform_indices = @transform_7, window_bounds = array<i64: 1, 32>}, {pipeline_mode = #tpu.pipeline_mode<synchronous>, transform_indices = @transform_8, window_bounds = array<i64: 32, 128>}, {pipeline_mode = #tpu.pipeline_mode<synchronous>, transform_indices = @transform_9, window_bounds = array<i64: 1, 128>}, {pipeline_mode = #tpu.pipeline_mode<synchronous>, transform_indices = @transform_10, window_bounds = array<i64: 128, 32>}, {pipeline_mode = #tpu.pipeline_mode<synchronous>, transform_indices = @transform_11, window_bounds = array<i64: 1, 32>}, {transform_indices = @transform_12, window_bounds = array<i64: 8, 8, 32>}]} {
    %c0 = arith.constant 0 : index
    %c0_0 = arith.constant 0 : index
    %c0_1 = arith.constant 0 : index
    %0 = vector.load %arg1[%c0, %c0_0, %c0_1] : memref<8x8x32xf32, #tpu.memory_space<vmem>>, vector<8x8x32xf32>
    %1 = vector.shape_cast %0 : vector<8x8x32xf32> to vector<64x32xf32>
    %c0_2 = arith.constant 0 : index
    %c0_3 = arith.constant 0 : index
    %2 = vector.load %arg2[%c0_2, %c0_3] : memref<1x32xf32, #tpu.memory_space<vmem>>, vector<1x32xf32>
    %c0_4 = arith.constant 0 : index
    %c0_5 = arith.constant 0 : index
    %3 = vector.load %arg3[%c0_4, %c0_5] : memref<1x32xf32, #tpu.memory_space<vmem>>, vector<1x32xf32>
    %cst = arith.constant dense<0.000000e+00> : vector<64xf32>
    %4 = vector.multi_reduction <add>, %1, %cst [1] : vector<64x32xf32> to vector<64xf32>
    %5 = vector.shape_cast %4 : vector<64xf32> to vector<64x1xf32>
    %cst_6 = arith.constant 3.200000e+01 : f32
    %6 = vector.broadcast %cst_6 : f32 to vector<64x1xf32>
    %7 = arith.divf %5, %6 : vector<64x1xf32>
    %8 = vector.broadcast %7 : vector<64x1xf32> to vector<64x32xf32>
    %9 = arith.subf %1, %8 : vector<64x32xf32>
    %10 = arith.mulf %9, %9 : vector<64x32xf32>
    %cst_7 = arith.constant dense<0.000000e+00> : vector<64xf32>
    %11 = vector.multi_reduction <add>, %10, %cst_7 [1] : vector<64x32xf32> to vector<64xf32>
    %12 = vector.shape_cast %11 : vector<64xf32> to vector<64x1xf32>
    %cst_8 = arith.constant 3.200000e+01 : f32
    %13 = vector.broadcast %cst_8 : f32 to vector<64x1xf32>
    %14 = arith.divf %12, %13 : vector<64x1xf32>
    %15 = vector.broadcast %7 : vector<64x1xf32> to vector<64x32xf32>
    %16 = arith.subf %1, %15 : vector<64x32xf32>
    %cst_9 = arith.constant 9.99999974E-6 : f32
    %17 = vector.broadcast %cst_9 : f32 to vector<64x1xf32>
    %18 = arith.addf %14, %17 : vector<64x1xf32>
    %19 = math.rsqrt %18 : vector<64x1xf32>
    %20 = vector.broadcast %19 : vector<64x1xf32> to vector<64x32xf32>
    %21 = arith.mulf %16, %20 : vector<64x32xf32>
    %22 = vector.broadcast %2 : vector<1x32xf32> to vector<64x32xf32>
    %23 = arith.mulf %21, %22 : vector<64x32xf32>
    %24 = vector.broadcast %3 : vector<1x32xf32> to vector<64x32xf32>
    %25 = arith.addf %23, %24 : vector<64x32xf32>
    %c0_10 = arith.constant 0 : index
    %c0_11 = arith.constant 0 : index
    %26 = vector.load %arg4[%c0_10, %c0_11] : memref<32x96xf32, #tpu.memory_space<vmem>>, vector<32x96xf32>
    %cst_12 = arith.constant dense<0.000000e+00> : vector<64x96xf32>
    %27 = tpu.matmul %25, %26, %cst_12 {dimension_numbers = #tpu.dot_dimension_numbers<[1], [0], [0], [1], [0, 0, 1, 1], [], []>} : vector<64x32xf32>, vector<32x96xf32>, vector<64x96xf32> -> vector<64x96xf32>
    %28 = vector.extract_strided_slice %27 {offsets = [0, 0], sizes = [64, 32], strides = [1, 1]} : vector<64x96xf32> to vector<64x32xf32>
    %29 = vector.shape_cast %28 : vector<64x32xf32> to vector<8x8x32xf32>
    %30 = vector.extract_strided_slice %27 {offsets = [0, 32], sizes = [64, 32], strides = [1, 1]} : vector<64x96xf32> to vector<64x32xf32>
    %31 = vector.shape_cast %30 : vector<64x32xf32> to vector<8x8x32xf32>
    %32 = vector.extract_strided_slice %27 {offsets = [0, 64], sizes = [64, 32], strides = [1, 1]} : vector<64x96xf32> to vector<64x32xf32>
    %33 = vector.shape_cast %32 : vector<64x32xf32> to vector<8x8x32xf32>
    %34 = vector.extract_strided_slice %29 {offsets = [0, 0, 0], sizes = [8, 8, 8], strides = [1, 1, 1]} : vector<8x8x32xf32> to vector<8x8x8xf32>
    %35 = vector.extract_strided_slice %29 {offsets = [0, 0, 8], sizes = [8, 8, 8], strides = [1, 1, 1]} : vector<8x8x32xf32> to vector<8x8x8xf32>
    %36 = vector.extract_strided_slice %29 {offsets = [0, 0, 16], sizes = [8, 8, 8], strides = [1, 1, 1]} : vector<8x8x32xf32> to vector<8x8x8xf32>
    %37 = vector.extract_strided_slice %29 {offsets = [0, 0, 24], sizes = [8, 8, 8], strides = [1, 1, 1]} : vector<8x8x32xf32> to vector<8x8x8xf32>
    %38 = tpu.concatenate %34, %35, %36, %37 in 0 : vector<8x8x8xf32>, vector<8x8x8xf32>, vector<8x8x8xf32>, vector<8x8x8xf32> -> vector<32x8x8xf32>
    %39 = vector.extract_strided_slice %31 {offsets = [0, 0, 0], sizes = [8, 8, 8], strides = [1, 1, 1]} : vector<8x8x32xf32> to vector<8x8x8xf32>
    %40 = vector.extract_strided_slice %31 {offsets = [0, 0, 8], sizes = [8, 8, 8], strides = [1, 1, 1]} : vector<8x8x32xf32> to vector<8x8x8xf32>
    %41 = vector.extract_strided_slice %31 {offsets = [0, 0, 16], sizes = [8, 8, 8], strides = [1, 1, 1]} : vector<8x8x32xf32> to vector<8x8x8xf32>
    %42 = vector.extract_strided_slice %31 {offsets = [0, 0, 24], sizes = [8, 8, 8], strides = [1, 1, 1]} : vector<8x8x32xf32> to vector<8x8x8xf32>
    %43 = tpu.concatenate %39, %40, %41, %42 in 0 : vector<8x8x8xf32>, vector<8x8x8xf32>, vector<8x8x8xf32>, vector<8x8x8xf32> -> vector<32x8x8xf32>
    %44 = vector.extract_strided_slice %33 {offsets = [0, 0, 0], sizes = [8, 8, 8], strides = [1, 1, 1]} : vector<8x8x32xf32> to vector<8x8x8xf32>
    %45 = vector.extract_strided_slice %33 {offsets = [0, 0, 8], sizes = [8, 8, 8], strides = [1, 1, 1]} : vector<8x8x32xf32> to vector<8x8x8xf32>
    %46 = vector.extract_strided_slice %33 {offsets = [0, 0, 16], sizes = [8, 8, 8], strides = [1, 1, 1]} : vector<8x8x32xf32> to vector<8x8x8xf32>
    %47 = vector.extract_strided_slice %33 {offsets = [0, 0, 24], sizes = [8, 8, 8], strides = [1, 1, 1]} : vector<8x8x32xf32> to vector<8x8x8xf32>
    %48 = tpu.concatenate %44, %45, %46, %47 in 0 : vector<8x8x8xf32>, vector<8x8x8xf32>, vector<8x8x8xf32>, vector<8x8x8xf32> -> vector<32x8x8xf32>
    "tpu.trace_start"() <{level = 10 : i32, message = "bqd,bkd->bqk"}> : () -> ()
    %cst_13 = arith.constant dense<0.000000e+00> : vector<32x8x8xf32>
    %49 = tpu.matmul %38, %43, %cst_13 {dimension_numbers = #tpu.dot_dimension_numbers<[2], [2], [1], [1], [0, 0, 0, 1, 1, 1], [0], [0]>} : vector<32x8x8xf32>, vector<32x8x8xf32>, vector<32x8x8xf32> -> vector<32x8x8xf32>
    "tpu.trace_stop"() : () -> ()
    %cst_14 = arith.constant 0.353553385 : f32
    %50 = vector.broadcast %cst_14 : f32 to vector<32x8x8xf32>
    %51 = arith.mulf %49, %50 : vector<32x8x8xf32>
    %cst_15 = arith.constant dense<0xFF800000> : vector<32x8xf32>
    %52 = vector.multi_reduction <maximumf>, %51, %cst_15 [2] : vector<32x8x8xf32> to vector<32x8xf32>
    %53 = vector.shape_cast %52 : vector<32x8xf32> to vector<32x8x1xf32>
    %54 = vector.broadcast %53 : vector<32x8x1xf32> to vector<32x8x8xf32>
    %55 = arith.subf %51, %54 : vector<32x8x8xf32>
    %56 = math.exp %55 : vector<32x8x8xf32>
    %cst_16 = arith.constant dense<0.000000e+00> : vector<32x8xf32>
    %57 = vector.multi_reduction <add>, %56, %cst_16 [2] : vector<32x8x8xf32> to vector<32x8xf32>
    %58 = vector.shape_cast %57 : vector<32x8xf32> to vector<32x8x1xf32>
    %59 = tpu.reciprocal %58 {approx = true} : vector<32x8x1xf32> -> vector<32x8x1xf32>
    %60 = vector.broadcast %59 : vector<32x8x1xf32> to vector<32x8x8xf32>
    %61 = arith.mulf %56, %60 : vector<32x8x8xf32>
    "tpu.trace_start"() <{level = 10 : i32, message = "bqk,bkd->bqd"}> : () -> ()
    %cst_17 = arith.constant dense<0.000000e+00> : vector<32x8x8xf32>
    %62 = tpu.matmul %61, %48, %cst_17 {dimension_numbers = #tpu.dot_dimension_numbers<[2], [1], [1], [2], [0, 0, 0, 1, 1, 2], [0], [0]>} : vector<32x8x8xf32>, vector<32x8x8xf32>, vector<32x8x8xf32> -> vector<32x8x8xf32>
    "tpu.trace_stop"() : () -> ()
    %63 = vector.extract_strided_slice %62 {offsets = [0, 0, 0], sizes = [8, 8, 8], strides = [1, 1, 1]} : vector<32x8x8xf32> to vector<8x8x8xf32>
    %64 = vector.extract_strided_slice %62 {offsets = [8, 0, 0], sizes = [8, 8, 8], strides = [1, 1, 1]} : vector<32x8x8xf32> to vector<8x8x8xf32>
    %65 = vector.extract_strided_slice %62 {offsets = [16, 0, 0], sizes = [8, 8, 8], strides = [1, 1, 1]} : vector<32x8x8xf32> to vector<8x8x8xf32>
    %66 = vector.extract_strided_slice %62 {offsets = [24, 0, 0], sizes = [8, 8, 8], strides = [1, 1, 1]} : vector<32x8x8xf32> to vector<8x8x8xf32>
    %67 = tpu.concatenate %63, %64, %65, %66 in 2 : vector<8x8x8xf32>, vector<8x8x8xf32>, vector<8x8x8xf32>, vector<8x8x8xf32> -> vector<8x8x32xf32>
    %68 = vector.shape_cast %67 : vector<8x8x32xf32> to vector<64x32xf32>
    %c0_18 = arith.constant 0 : index
    %c0_19 = arith.constant 0 : index
    %69 = vector.load %arg5[%c0_18, %c0_19] : memref<32x32xf32, #tpu.memory_space<vmem>>, vector<32x32xf32>
    %cst_20 = arith.constant dense<0.000000e+00> : vector<64x32xf32>
    %70 = tpu.matmul %68, %69, %cst_20 {dimension_numbers = #tpu.dot_dimension_numbers<[1], [0], [0], [1], [0, 0, 1, 1], [], []>} : vector<64x32xf32>, vector<32x32xf32>, vector<64x32xf32> -> vector<64x32xf32>
    %c0_21 = arith.constant 0 : index
    %c0_22 = arith.constant 0 : index
    %71 = vector.load %arg6[%c0_21, %c0_22] : memref<1x32xf32, #tpu.memory_space<vmem>>, vector<1x32xf32>
    %72 = vector.broadcast %71 : vector<1x32xf32> to vector<64x32xf32>
    %73 = arith.addf %70, %72 : vector<64x32xf32>
    %74 = arith.addf %1, %73 : vector<64x32xf32>
    %c0_23 = arith.constant 0 : index
    %c0_24 = arith.constant 0 : index
    %75 = vector.load %arg7[%c0_23, %c0_24] : memref<1x32xf32, #tpu.memory_space<vmem>>, vector<1x32xf32>
    %c0_25 = arith.constant 0 : index
    %c0_26 = arith.constant 0 : index
    %76 = vector.load %arg8[%c0_25, %c0_26] : memref<1x32xf32, #tpu.memory_space<vmem>>, vector<1x32xf32>
    %cst_27 = arith.constant dense<0.000000e+00> : vector<64xf32>
    %77 = vector.multi_reduction <add>, %74, %cst_27 [1] : vector<64x32xf32> to vector<64xf32>
    %78 = vector.shape_cast %77 : vector<64xf32> to vector<64x1xf32>
    %cst_28 = arith.constant 3.200000e+01 : f32
    %79 = vector.broadcast %cst_28 : f32 to vector<64x1xf32>
    %80 = arith.divf %78, %79 : vector<64x1xf32>
    %81 = vector.broadcast %80 : vector<64x1xf32> to vector<64x32xf32>
    %82 = arith.subf %74, %81 : vector<64x32xf32>
    %83 = arith.mulf %82, %82 : vector<64x32xf32>
    %cst_29 = arith.constant dense<0.000000e+00> : vector<64xf32>
    %84 = vector.multi_reduction <add>, %83, %cst_29 [1] : vector<64x32xf32> to vector<64xf32>
    %85 = vector.shape_cast %84 : vector<64xf32> to vector<64x1xf32>
    %cst_30 = arith.constant 3.200000e+01 : f32
    %86 = vector.broadcast %cst_30 : f32 to vector<64x1xf32>
    %87 = arith.divf %85, %86 : vector<64x1xf32>
    %88 = vector.broadcast %80 : vector<64x1xf32> to vector<64x32xf32>
    %89 = arith.subf %74, %88 : vector<64x32xf32>
    %cst_31 = arith.constant 9.99999974E-6 : f32
    %90 = vector.broadcast %cst_31 : f32 to vector<64x1xf32>
    %91 = arith.addf %87, %90 : vector<64x1xf32>
    %92 = math.rsqrt %91 : vector<64x1xf32>
    %93 = vector.broadcast %92 : vector<64x1xf32> to vector<64x32xf32>
    %94 = arith.mulf %89, %93 : vector<64x32xf32>
    %95 = vector.broadcast %75 : vector<1x32xf32> to vector<64x32xf32>
    %96 = arith.mulf %94, %95 : vector<64x32xf32>
    %97 = vector.broadcast %76 : vector<1x32xf32> to vector<64x32xf32>
    %98 = arith.addf %96, %97 : vector<64x32xf32>
    %c0_32 = arith.constant 0 : index
    %c0_33 = arith.constant 0 : index
    %99 = vector.load %arg9[%c0_32, %c0_33] : memref<32x128xf32, #tpu.memory_space<vmem>>, vector<32x128xf32>
    %cst_34 = arith.constant dense<0.000000e+00> : vector<64x128xf32>
    %100 = tpu.matmul %98, %99, %cst_34 {dimension_numbers = #tpu.dot_dimension_numbers<[1], [0], [0], [1], [0, 0, 1, 1], [], []>} : vector<64x32xf32>, vector<32x128xf32>, vector<64x128xf32> -> vector<64x128xf32>
    %c0_35 = arith.constant 0 : index
    %c0_36 = arith.constant 0 : index
    %101 = vector.load %arg10[%c0_35, %c0_36] : memref<1x128xf32, #tpu.memory_space<vmem>>, vector<1x128xf32>
    %102 = vector.broadcast %101 : vector<1x128xf32> to vector<64x128xf32>
    %103 = arith.addf %100, %102 : vector<64x128xf32>
    %cst_37 = arith.constant 0.000000e+00 : f32
    %104 = vector.broadcast %cst_37 : f32 to vector<64x128xf32>
    %105 = arith.maximumf %103, %104 : vector<64x128xf32>
    %c0_38 = arith.constant 0 : index
    %c0_39 = arith.constant 0 : index
    %106 = vector.load %arg11[%c0_38, %c0_39] : memref<128x32xf32, #tpu.memory_space<vmem>>, vector<128x32xf32>
    %cst_40 = arith.constant dense<0.000000e+00> : vector<64x32xf32>
    %107 = tpu.matmul %105, %106, %cst_40 {dimension_numbers = #tpu.dot_dimension_numbers<[1], [0], [0], [1], [0, 0, 1, 1], [], []>} : vector<64x128xf32>, vector<128x32xf32>, vector<64x32xf32> -> vector<64x32xf32>
    %c0_41 = arith.constant 0 : index
    %c0_42 = arith.constant 0 : index
    %108 = vector.load %arg12[%c0_41, %c0_42] : memref<1x32xf32, #tpu.memory_space<vmem>>, vector<1x32xf32>
    %109 = vector.broadcast %108 : vector<1x32xf32> to vector<64x32xf32>
    %110 = arith.addf %107, %109 : vector<64x32xf32>
    %111 = arith.addf %74, %110 : vector<64x32xf32>
    %112 = vector.shape_cast %111 : vector<64x32xf32> to vector<8x8x32xf32>
    %c0_43 = arith.constant 0 : index
    %c0_44 = arith.constant 0 : index
    %c0_45 = arith.constant 0 : index
    %113 = vector.load %arg13[%c0_43, %c0_44, %c0_45] : memref<8x8x32xf32, #tpu.memory_space<vmem>>, vector<8x8x32xf32>
    tpu.vector_store %arg13[%c0_43, %c0_44, %c0_45], %112 {strides = array<i32>} : memref<8x8x32xf32, #tpu.memory_space<vmem>>, vector<8x8x32xf32>,
    return
  }
  func.func @transform_0(%arg0: i32) -> (i32, i32, i32) {
    %c0_i32 = arith.constant 0 : i32
    %c0_i32_0 = arith.constant 0 : i32
    %c0_i32_1 = arith.constant 0 : i32
    return %arg0, %c0_i32, %c0_i32_0 : i32, i32, i32
  }
  func.func @transform_1(%arg0: i32) -> (i32, i32) {
    %c0_i32 = arith.constant 0 : i32
    %c0_i32_0 = arith.constant 0 : i32
    %c0_i32_1 = arith.constant 0 : i32
    return %c0_i32, %c0_i32_0 : i32, i32
  }
  func.func @transform_2(%arg0: i32) -> (i32, i32) {
    %c0_i32 = arith.constant 0 : i32
    %c0_i32_0 = arith.constant 0 : i32
    %c0_i32_1 = arith.constant 0 : i32
    return %c0_i32, %c0_i32_0 : i32, i32
  }
  func.func @transform_3(%arg0: i32) -> (i32, i32) {
    %c0_i32 = arith.constant 0 : i32
    %c0_i32_0 = arith.constant 0 : i32
    %c0_i32_1 = arith.constant 0 : i32
    return %c0_i32, %c0_i32_0 : i32, i32
  }
  func.func @transform_4(%arg0: i32) -> (i32, i32) {
    %c0_i32 = arith.constant 0 : i32
    %c0_i32_0 = arith.constant 0 : i32
    %c0_i32_1 = arith.constant 0 : i32
    return %c0_i32, %c0_i32_0 : i32, i32
  }
  func.func @transform_5(%arg0: i32) -> (i32, i32) {
    %c0_i32 = arith.constant 0 : i32
    %c0_i32_0 = arith.constant 0 : i32
    %c0_i32_1 = arith.constant 0 : i32
    return %c0_i32, %c0_i32_0 : i32, i32
  }
  func.func @transform_6(%arg0: i32) -> (i32, i32) {
    %c0_i32 = arith.constant 0 : i32
    %c0_i32_0 = arith.constant 0 : i32
    %c0_i32_1 = arith.constant 0 : i32
    return %c0_i32, %c0_i32_0 : i32, i32
  }
  func.func @transform_7(%arg0: i32) -> (i32, i32) {
    %c0_i32 = arith.constant 0 : i32
    %c0_i32_0 = arith.constant 0 : i32
    %c0_i32_1 = arith.constant 0 : i32
    return %c0_i32, %c0_i32_0 : i32, i32
  }
  func.func @transform_8(%arg0: i32) -> (i32, i32) {
    %c0_i32 = arith.constant 0 : i32
    %c0_i32_0 = arith.constant 0 : i32
    %c0_i32_1 = arith.constant 0 : i32
    return %c0_i32, %c0_i32_0 : i32, i32
  }
  func.func @transform_9(%arg0: i32) -> (i32, i32) {
    %c0_i32 = arith.constant 0 : i32
    %c0_i32_0 = arith.constant 0 : i32
    %c0_i32_1 = arith.constant 0 : i32
    return %c0_i32, %c0_i32_0 : i32, i32
  }
  func.func @transform_10(%arg0: i32) -> (i32, i32) {
    %c0_i32 = arith.constant 0 : i32
    %c0_i32_0 = arith.constant 0 : i32
    %c0_i32_1 = arith.constant 0 : i32
    return %c0_i32, %c0_i32_0 : i32, i32
  }
  func.func @transform_11(%arg0: i32) -> (i32, i32) {
    %c0_i32 = arith.constant 0 : i32
    %c0_i32_0 = arith.constant 0 : i32
    %c0_i32_1 = arith.constant 0 : i32
    return %c0_i32, %c0_i32_0 : i32, i32
  }
  func.func @transform_12(%arg0: i32) -> (i32, i32, i32) {
    %c0_i32 = arith.constant 0 : i32
    %c0_i32_0 = arith.constant 0 : i32
    %c0_i32_1 = arith.constant 0 : i32
    return %arg0, %c0_i32, %c0_i32_0 : i32, i32, i32
  }
}

</mosaic_0001>

<bundles_post_ra>
// kernel: tpu_custom_call.1
= control target key start
LH: loop header
LB: loop body
LE: loop exit
PB: predicated region body
PF: predicated region fallthrough
CT: control target
= control target key end

     0   :  { %17 = vsyncpa [#allocation3], 0  ;;  %s8806_s0 = inlined_call_operand.vmem [shape: f32[8,8,32], index: 0, kind: input, shape index: {}]   ;;  %s8807_s1 = inlined_call_operand.vmem [shape: f32[1,32], index: 1, kind: input, shape index: {}]   ;;  %s8808_s2 = inlined_call_operand.vmem [shape: f32[1,32], index: 2, kind: input, shape index: {}]   ;;  %s8809_s3 = inlined_call_operand.vmem [shape: f32[32,96], index: 3, kind: input, shape index: {}]   ;;  %s8810_s4 = inlined_call_operand.vmem [shape: f32[32,32], index: 4, kind: input, shape index: {}]   ;;  %s8811_s5 = inlined_call_operand.vmem [shape: f32[1,32], index: 5, kind: input, shape index: {}]   ;;  %s8812_s6 = inlined_call_operand.vmem [shape: f32[1,32], index: 6, kind: input, shape index: {}]   ;;  %s8813_s7 = inlined_call_operand.vmem [shape: f32[1,32], index: 7, kind: input, shape index: {}]   ;;  %s8814_s8 = inlined_call_operand.vmem [shape: f32[32,128], index: 8, kind: input, shape index: {}]   ;;  %s8815_s9 = inlined_call_operand.hbm [shape: f32[1,128], index: 9, kind: input, shape index: {}]   ;;  %s8816_s10 = inlined_call_operand.vmem [shape: f32[128,32], index: 10, kind: input, shape index: {}]   ;;  %s8817_s11 = inlined_call_operand.vmem [shape: f32[1,32], index: 11, kind: input, shape index: {}]   ;;  %s8818_s12 = inlined_call_operand.hbm [shape: f32[8,8,32], index: 12, kind: output, shape index: {}]  }
   0x1   :  { %18 = vsyncpa [#allocation4], 0  ;;  %s7373_s21 = smov [#allocation2]   ;;  %s7325_s25 = scalar_lea.hbm %s8815_s9, 16 }
   0x2   :  { %s43_s22 = sshll.u32 %s7373_s21, 4  ;;  %p7326_p0 = scmp.ne.s32.totalorder %s8815_s9, %s7325_s25  ;;  %s44_s22 = int_to_ptr.vmem [resolvable:$true] %s43_s22 }
   0x3   :  { %p7329_p1 = scmp.lt.u32.totalorder %s7325_s25, %s8815_s9 }
   0x5   :  { %p7331_p2 = pnand %p7329_p1, %p7326_p0 }
   0x7   :  { %7334 = shalt.err (!%p7331_p2)
}
   0x8   :  { %s7335_s30 = scalar_lea.vmem %s44_s22, 16  ;;  %s7339_s13 = scalar_lea.vmem %s44_s22, 32 }
   0x9   :  { %p7336_p3 = scmp.ne.s32.totalorder %s44_s22, %s7335_s30  ;;  %p7340_p4 = scmp.lt.s32.totalorder %s44_s22, %s44_s22 }
   0xa   :  { %p7341_p5 = scmp.lt.s32.totalorder %s7339_s13, %s7335_s30 }
   0xc   :  { %p7342_p6 = por %p7341_p5, %p7340_p4 }
   0xe   :  { %p7343_p7 = pnand %p7342_p6, %p7336_p3 }
  0x10   :  { %7346 = shalt.err (!%p7343_p7)
}
  0x11   :  { %46 = dma.hbm_to_vmem [thread:$0]  %s8815_s9, 16, %s44_s22, [#allocation3]  }
  0x12   :  { %7369 = dma.done.wait [#allocation3], 16  }
  0x13   :  { %7370 = vsyncadd [#allocation3], 4294967280  ;;  %vm64_vm0 = vcmask 261120   ;;  %v54_v0 = vld [vmem:[%s8806_s0] sm:$0xff]  ;;  %v56_v1 = vld [vmem:[%s8806_s0 + $0x10] sm:$0xff]  ;;  %vm7377_vm1 = vmmov 0  }
  0x14   :  { %v55_v2 = vld [vmem:[%s8806_s0 + $0x8] sm:$0xff]  ;;  %v65_v3 = vsel %vm64_vm0, %v54_v0, 0.0  ;;  %v71_v4 = vsel %vm64_vm0, %v56_v1, 0.0  ;;  %v57_v5 = vld [vmem:[%s8806_s0 + $0x18] sm:$0xff]  ;;  %v58_v8 = vld [vmem:[%s8806_s0 + $0x20] sm:$0xff]  ;;  %s7378_s23 = smov 104  }
  0x15   :  { %66 = vadd.xlane.f32.xlu0 %v65_v3  ;;  %72 = vadd.xlane.f32.xlu1 %v71_v4  ;;  %v68_v6 = vsel %vm64_vm0, %v55_v2, 0.0  ;;  %v74_v7 = vsel %vm64_vm0, %v57_v5, 0.0  ;;  %v59_v9 = vld [vmem:[%s8806_s0 + $0x28] sm:$0xff]  ;;  %v77_v10 = vsel %vm64_vm0, %v58_v8, 0.0  ;;  %v60_v12 = vld [vmem:[%s8806_s0 + $0x30] sm:$0xff]  ;;  %v61_v13 = vld [vmem:[%s8806_s0 + $0x38] sm:$0xff] }
  0x16   :  { %v80_v11 = vsel %vm64_vm0, %v59_v9, 0.0  ;;  %v83_v14 = vsel %vm64_vm0, %v60_v12, 0.0  ;;  %v86_v15 = vsel %vm64_vm0, %v61_v13, 0.0  ;;  %v198_v56 = vld [vmem:[%s8809_s3] sm:$0xff]  ;;  %v199_v57 = vld [vmem:[%s8809_s3 + $0x8] sm:$0xff]  ;;  %v200_v59 = vld [vmem:[%s8809_s3 + $0x10] sm:$0xff] }
  0x17   :  { %v7088_v58 = vpack.c.bf16 %v199_v57, %v198_v56  ;;  %v201_v60 = vld [vmem:[%s8809_s3 + $0x18] sm:$0xff]  ;;  %s7379_s24 = smov 96   ;;  %vm389_vm2 = vcmask 64512   ;;  %s7380_s25 = smov 64   ;;  %vm5740_vm3 = vcmask 130048   ;;  %vm5749_vm4 = vcmask 195584  }
  0x18   :  { %v7092_v61 = vpack.c.bf16 %v201_v60, %v200_v59  ;;  %s7381_s26 = smov 8   ;;  %s7382_s13 = smov 16  }
  0x19   :  { %69 = vadd.xlane.f32.xlu0 %v68_v6  ;;  %75 = vadd.xlane.f32.xlu1 %v74_v7 }
  0x1a   :  { %7089 = vmatprep.subr.bf16.mxu0 %v7088_v58 }
  0x1b   :  { %7091 = vmatpush3.bf16.msra.mxu0 %v7088_v58 }
  0x1c   :  { %7093 = vmatprep.subr.bf16.mxu0 %v7092_v61 }
  0x1d   :  { %78 = vadd.xlane.f32.xlu0 %v77_v10  ;;  %81 = vadd.xlane.f32.xlu1 %v80_v11 }
  0x1f   :  { %7095 = vmatpush3.bf16.msra.mxu0 %v7092_v61 }
  0x21   :  { %84 = vadd.xlane.f32.xlu0 %v83_v14  ;;  %87 = vadd.xlane.f32.xlu1 %v86_v15 }
  0xa2   :  { %v67_v16 = vpop.xlane.xlu0 %66  ;;  %v73_v17 = vpop.xlane.xlu1 %72 }
  0xa3   :  { %v90_v18 = vmul.f32 0.03125, %v67_v16  ;;  %v92_v19 = vmul.f32 0.03125, %v73_v17 }
  0xa5   :  { %v7495_v20 = vsub.f32 %v54_v0, %v90_v18  ;;  %v7497_v21 = vsub.f32 %v56_v1, %v92_v19 }
  0xa6   :  { %v70_v22 = vpop.xlane.xlu0 %69  ;;  %v76_v23 = vpop.xlane.xlu1 %75 }
  0xa7   :  { %v91_v24 = vmul.f32 0.03125, %v70_v22  ;;  %v93_v25 = vmul.f32 0.03125, %v76_v23  ;;  %v106_v26 = vmul.f32 %v7495_v20, %v7495_v20  ;;  %v108_v27 = vmul.f32 %v7497_v21, %v7497_v21  ;;  %v6349_v22 = vld [vmem:[%s8807_s1] ss:$0 sm:$0xff]  ;;  %s7374_s1 = smov 120  }
  0xa9   :  { %v7503_v28 = vsub.f32 %v55_v2, %v91_v24  ;;  %v7505_v29 = vsub.f32 %v57_v5, %v93_v25  ;;  %v114_v30 = vsel %vm64_vm0, %v106_v26, 0.0  ;;  %v120_v33 = vsel %vm64_vm0, %v108_v27, 0.0  ;;  %v6350_v26 = vld [vmem:[%s8808_s2] ss:$0 sm:$0xff]  ;;  %s7375_s2 = smov 112  }
  0xaa   :  { %115 = vadd.xlane.f32.xlu0 %v114_v30  ;;  %v79_v31 = vpop.xlane.xlu0 %78  ;;  %v82_v32 = vpop.xlane.xlu1 %81 }
  0xab   :  { %v94_v34 = vmul.f32 0.03125, %v79_v31  ;;  %v95_v35 = vmul.f32 0.03125, %v82_v32  ;;  %v107_v36 = vmul.f32 %v7503_v28, %v7503_v28  ;;  %v109_v37 = vmul.f32 %v7505_v29, %v7505_v29 }
  0xad   :  { %v7513_v38 = vsub.f32 %v58_v8, %v94_v34  ;;  %v7515_v39 = vsub.f32 %v59_v9, %v95_v35  ;;  %v117_v40 = vsel %vm64_vm0, %v107_v36, 0.0  ;;  %v123_v43 = vsel %vm64_vm0, %v109_v37, 0.0 }
  0xae   :  { %121 = vadd.xlane.f32.xlu0 %v120_v33  ;;  %118 = vadd.xlane.f32.xlu1 %v117_v40  ;;  %v85_v41 = vpop.xlane.xlu0 %84  ;;  %v88_v42 = vpop.xlane.xlu1 %87 }
  0xaf   :  { %v96_v44 = vmul.f32 0.03125, %v85_v41  ;;  %v97_v45 = vmul.f32 0.03125, %v88_v42  ;;  %v110_v46 = vmul.f32 %v7513_v38, %v7513_v38  ;;  %v111_v47 = vmul.f32 %v7515_v39, %v7515_v39 }
  0xb1   :  { %v7523_v48 = vsub.f32 %v60_v12, %v96_v44  ;;  %v7525_v49 = vsub.f32 %v61_v13, %v97_v45  ;;  %v126_v50 = vsel %vm64_vm0, %v110_v46, 0.0  ;;  %v129_v51 = vsel %vm64_vm0, %v111_v47, 0.0 }
  0xb2   :  { %124 = vadd.xlane.f32.xlu1 %v123_v43  ;;  %127 = vadd.xlane.f32.xlu0 %v126_v50 }
  0xb3   :  { %v112_v52 = vmul.f32 %v7523_v48, %v7523_v48  ;;  %v113_v53 = vmul.f32 %v7525_v49, %v7525_v49 }
  0xb5   :  { %v132_v54 = vsel %vm64_vm0, %v112_v52, 0.0  ;;  %v135_v55 = vsel %vm64_vm0, %v113_v53, 0.0 }
  0xb6   :  { %130 = vadd.xlane.f32.xlu1 %v129_v51  ;;  %133 = vadd.xlane.f32.xlu0 %v132_v54 }
  0xba   :  { %136 = vadd.xlane.f32.xlu1 %v135_v55 }
 0x137   :  { %v116_v62 = vpop.xlane.xlu0 %115 }
 0x138   :  { %v138_v63 = vmul.f32 0.03125, %v116_v62 }
 0x13a   :  { %v146_v0 = vadd.f32 1e-05, %v138_v63 }
 0x13b   :  { %v119_v1 = vpop.xlane.xlu1 %118  ;;  %v122_v2 = vpop.xlane.xlu0 %121 }
 0x13c   :  { %7157 = vrsqrt.f32 %v146_v0  ;;  %v139_v3 = vmul.f32 0.03125, %v119_v1  ;;  %v140_v4 = vmul.f32 0.03125, %v122_v2  ;;  %v8819_v0 = vmov 0.0  }
 0x13d   :  { %6684 = vmatprep.subr.mxu1 %v8819_v0  ;;  %6709 = vmatprep.subr.mxu0 %v8819_v0 }
 0x13e   :  { %v147_v5 = vadd.f32 1e-05, %v139_v3  ;;  %v148_v6 = vadd.f32 1e-05, %v140_v4  ;;  %6686 = vmatprep.mubr.msk.f32.mxu1 %vm7377_vm1, %v8819_v0 }
 0x13f   :  { %v125_v7 = vpop.xlane.xlu1 %124  ;;  %v128_v8 = vpop.xlane.xlu0 %127 }
 0x140   :  { %7159 = vrsqrt.f32 %v147_v5  ;;  %v141_v9 = vmul.f32 0.03125, %v125_v7  ;;  %v142_v10 = vmul.f32 0.03125, %v128_v8 }
 0x141   :  { %7161 = vrsqrt.f32 %v148_v6 }
 0x142   :  { %v149_v11 = vadd.f32 1e-05, %v141_v9  ;;  %v150_v12 = vadd.f32 1e-05, %v142_v10 }
 0x143   :  { %v131_v13 = vpop.xlane.xlu1 %130  ;;  %v134_v14 = vpop.xlane.xlu0 %133 }
 0x144   :  { %7163 = vrsqrt.f32 %v149_v11  ;;  %v143_v15 = vmul.f32 0.03125, %v131_v13  ;;  %v144_v16 = vmul.f32 0.03125, %v134_v14 }
 0x145   :  { %7165 = vrsqrt.f32 %v150_v12 }
 0x146   :  { %v7158_v17 = vpop.eup %7157  ;;  %v151_v18 = vadd.f32 1e-05, %v143_v15  ;;  %v152_v19 = vadd.f32 1e-05, %v144_v16 }
 0x147   :  { %v137_v23 = vpop.xlane.xlu1 %136  ;;  %v162_v24 = vmul.f32 %v7158_v17, %v7495_v20 }
 0x148   :  { %7167 = vrsqrt.f32 %v151_v18  ;;  %v145_v25 = vmul.f32 0.03125, %v137_v23 }
 0x149   :  { %7169 = vrsqrt.f32 %v152_v19  ;;  %v176_v27 = vmul.f32 %v6349_v22, %v162_v24 }
 0x14a   :  { %v7160_v30 = vpop.eup %7159  ;;  %v153_v31 = vadd.f32 1e-05, %v145_v25 }
 0x14b   :  { %v7162_v32 = vpop.eup %7161  ;;  %v190_v33 = vadd.f32 %v6350_v26, %v176_v27  ;;  %v163_v34 = vmul.f32 %v7160_v30, %v7503_v28 }
 0x14c   :  { %7171 = vrsqrt.f32 %v153_v31  ;;  %v164_v35 = vmul.f32 %v7162_v32, %v7497_v21 }
 0x14d   :  { %6672 = vmatprep.mubr.msk.f32.mxu0 %vm64_vm0, %v190_v33  ;;  %v177_v20 = vmul.f32 %v6349_v22, %v163_v34 }
 0x14e   :  { %v7164_v36 = vpop.eup %7163  ;;  %v178_v37 = vmul.f32 %v6349_v22, %v164_v35 }
 0x14f   :  { %v7166_v40 = vpop.eup %7165  ;;  %v191_v41 = vadd.f32 %v6350_v26, %v177_v20  ;;  %v165_v42 = vmul.f32 %v7164_v36, %v7505_v29 }
 0x150   :  { %v192_v43 = vadd.f32 %v6350_v26, %v178_v37  ;;  %v166_v44 = vmul.f32 %v7166_v40, %v7513_v38 }
 0x151   :  { %6673 = vmatmul.mubr.msk.f32.vlgmr.msra.gmra.mrb[0].mxu0 %vm64_vm0, %v191_v41  ;;  %v179_v45 = vmul.f32 %v6349_v22, %v165_v42 }
 0x152   :  { %v7168_v46 = vpop.eup %7167  ;;  %6675 = vmatprep.mubr.msk.f32.mxu0 %vm64_vm0, %v192_v43  ;;  %v180_v28 = vmul.f32 %v6349_v22, %v166_v44 }
 0x153   :  { %v7170_v21 = vpop.eup %7169  ;;  %v193_v47 = vadd.f32 %v6350_v26, %v179_v45  ;;  %v167_v50 = vmul.f32 %v7168_v46, %v7515_v39 }
 0x154   :  { %v194_v51 = vadd.f32 %v6350_v26, %v180_v28  ;;  %v168_v52 = vmul.f32 %v7170_v21, %v7523_v48 }
 0x155   :  { %6676 = vmatmul.mubr.msk.f32.gmra.mrb[2].mxu0 %vm64_vm0, %v193_v47  ;;  %v181_v29 = vmul.f32 %v6349_v22, %v167_v50 }
 0x156   :  { %v7172_v53 = vpop.eup %7171  ;;  %6678 = vmatprep.mubr.msk.f32.mxu0 %vm64_vm0, %v194_v51  ;;  %v182_v38 = vmul.f32 %v6349_v22, %v168_v52 }
 0x157   :  { %v195_v54 = vadd.f32 %v6350_v26, %v181_v29  ;;  %v169_v55 = vmul.f32 %v7172_v53, %v7525_v49 }
 0x158   :  { %v196_v56 = vadd.f32 %v6350_v26, %v182_v38 }
 0x159   :  { %6679 = vmatmul.mubr.msk.f32.gmra.mrb[4].mxu0 %vm64_vm0, %v195_v54  ;;  %v183_v57 = vmul.f32 %v6349_v22, %v169_v55 }
 0x15a   :  { %6681 = vmatprep.mubr.msk.f32.mxu0 %vm64_vm0, %v196_v56 }
 0x15b   :  { %v197_v39 = vadd.f32 %v6350_v26, %v183_v57 }
 0x15d   :  { %6682 = vmatmul.mubr.msk.f32.gmra.mrb[6].mxu0 %vm64_vm0, %v197_v39 }
 0x15e   :  { %6711 = vmatprep.mubr.msk.f32.mxu0 %vm7377_vm1, %v8819_v0 }
 0x224   :  { %v7569_v48 = vpop.f32.mrb[0].mxu0 }
 0x225   :  { %341 = vrot.lane.b32.xlu1 %v7569_v48, %s7374_s1  ;;  %v7572_v58 = vpop.f32.mrb[1].mxu0 }
 0x226   :  { %339 = vrot.lane.b32.xlu0 %v7572_v58, %s7374_s1 }
 0x228   :  { %v7575_v59 = vpop.f32.mrb[2].mxu0 }
 0x229   :  { %357 = vrot.lane.b32.xlu1 %v7569_v48, %s7375_s2  ;;  %v7578_v49 = vpop.f32.mrb[3].mxu0 }
 0x22a   :  { %355 = vrot.lane.b32.xlu0 %v7572_v58, %s7375_s2 }
 0x22c   :  { %v7581_v60 = vpop.f32.mrb[4].mxu0 }
 0x22d   :  { %345 = vrot.lane.b32.xlu1 %v7575_v59, %s7374_s1  ;;  %v7584_v61 = vpop.f32.mrb[5].mxu0 }
 0x22e   :  { %347 = vrot.lane.b32.xlu0 %v7584_v61, %s7374_s1 }
 0x230   :  { %v7587_v62 = vpop.f32.mrb[6].mxu0 }
 0x231   :  { %343 = vrot.lane.b32.xlu1 %v7578_v49, %s7374_s1  ;;  %v7590_v63 = vpop.f32.mrb[7].mxu0 }
 0x232   :  { %351 = vrot.lane.b32.xlu0 %v7590_v63, %s7374_s1 }
 0x235   :  { %349 = vrot.lane.b32.xlu1 %v7581_v60, %s7374_s1 }
 0x236   :  { %359 = vrot.lane.b32.xlu0 %v7578_v49, %s7375_s2 }
 0x239   :  { %353 = vrot.lane.b32.xlu1 %v7587_v62, %s7374_s1 }
 0x23a   :  { %363 = vrot.lane.b32.xlu0 %v7584_v61, %s7375_s2 }
 0x23d   :  { %361 = vrot.lane.b32.xlu1 %v7575_v59, %s7375_s2 }
 0x23e   :  { %371 = vrot.lane.b32.xlu0 %v7572_v58, %s7378_s23 }
 0x241   :  { %365 = vrot.lane.b32.xlu1 %v7581_v60, %s7375_s2 }
 0x242   :  { %367 = vrot.lane.b32.xlu0 %v7590_v63, %s7375_s2 }
 0x245   :  { %369 = vrot.lane.b32.xlu1 %v7587_v62, %s7375_s2 }
 0x246   :  { %387 = vrot.lane.b32.xlu0 %v7572_v58, %s7379_s24 }
 0x249   :  { %373 = vrot.lane.b32.xlu1 %v7569_v48, %s7378_s23 }
 0x24a   :  { %377 = vrot.lane.b32.xlu0 %v7575_v59, %s7378_s23 }
 0x24d   :  { %375 = vrot.lane.b32.xlu1 %v7578_v49, %s7378_s23 }
 0x24e   :  { %379 = vrot.lane.b32.xlu0 %v7584_v61, %s7378_s23 }
 0x251   :  { %464 = vrot.lane.b32.xlu1 %v7569_v48, %s7379_s24 }
 0x252   :  { %540 = vrot.lane.b32.xlu0 %v7578_v49, %s7379_s24 }
 0x255   :  { %381 = vrot.lane.b32.xlu1 %v7581_v60, %s7378_s23 }
 0x256   :  { %385 = vrot.lane.b32.xlu0 %v7587_v62, %s7378_s23 }
 0x259   :  { %383 = vrot.lane.b32.xlu1 %v7590_v63, %s7378_s23 }
 0x25a   :  { %692 = vrot.lane.b32.xlu0 %v7584_v61, %s7379_s24 }
 0x25d   :  { %616 = vrot.lane.b32.xlu1 %v7575_v59, %s7379_s24 }
 0x25e   :  { %844 = vrot.lane.b32.xlu0 %v7590_v63, %s7379_s24 }
 0x261   :  { %768 = vrot.lane.b32.xlu1 %v7581_v60, %s7379_s24 }
 0x265   :  { %920 = vrot.lane.b32.xlu1 %v7587_v62, %s7379_s24 }
 0x297   :  { %v7631_v1 = vpop.permute.xlu1 %341 }
 0x298   :  { %1072 = vrot.lane.b32.xlu1 %v7631_v1, %s7379_s24  ;;  %v7635_v2 = vpop.permute.xlu0 %339 }
 0x299   :  { %996 = vrot.lane.b32.xlu0 %v7635_v2, %s7379_s24 }
 0x29b   :  { %v7639_v3 = vpop.permute.xlu1 %357 }
 0x29c   :  { %v7641_v4 = vpop.permute.xlu0 %355 }
 0x29f   :  { %v7643_v5 = vpop.permute.xlu1 %345 }
 0x2a0   :  { %1224 = vrot.lane.b32.xlu1 %v7643_v5, %s7379_s24  ;;  %v7647_v6 = vpop.permute.xlu0 %347 }
 0x2a3   :  { %v7649_v7 = vpop.permute.xlu1 %343 }
 0x2a4   :  { %1148 = vrot.lane.b32.xlu0 %v7649_v7, %s7379_s24  ;;  %v7653_v8 = vpop.permute.xlu0 %351 }
 0x2a7   :  { %v7655_v9 = vpop.permute.xlu1 %349 }
 0x2a8   :  { %1376 = vrot.lane.b32.xlu1 %v7655_v9, %s7379_s24  ;;  %1300 = vrot.lane.b32.xlu0 %v7647_v6, %s7379_s24  ;;  %v7661_v10 = vpop.permute.xlu0 %359 }
 0x2ab   :  { %v7663_v11 = vpop.permute.xlu1 %353 }
 0x2ac   :  { %1528 = vrot.lane.b32.xlu1 %v7663_v11, %s7379_s24  ;;  %1452 = vrot.lane.b32.xlu0 %v7653_v8, %s7379_s24  ;;  %v7669_v12 = vpop.permute.xlu0 %363 }
 0x2af   :  { %v7671_v13 = vpop.permute.xlu1 %361 }
 0x2b0   :  { %1680 = vrot.lane.b32.xlu1 %v7639_v3, %s7379_s24  ;;  %1604 = vrot.lane.b32.xlu0 %v7641_v4, %s7379_s24  ;;  %v7677_v14 = vpop.permute.xlu0 %371 }
 0x2b3   :  { %v7679_v15 = vpop.permute.xlu1 %365 }
 0x2b4   :  { %1832 = vrot.lane.b32.xlu1 %v7671_v13, %s7379_s24  ;;  %1756 = vrot.lane.b32.xlu0 %v7661_v10, %s7379_s24  ;;  %v7685_v16 = vpop.permute.xlu0 %367 }
 0x2b7   :  { %v7687_v17 = vpop.permute.xlu1 %369 }
 0x2b8   :  { %1984 = vrot.lane.b32.xlu1 %v7679_v15, %s7379_s24  ;;  %1908 = vrot.lane.b32.xlu0 %v7669_v12, %s7379_s24  ;;  %v388_v18 = vpop.permute.xlu0 %387 }
 0x2b9   :  { %6685 = vmatpush3.xpose.msk.msra.mxu1 %vm389_vm2, %v388_v18 }
 0x2ba   :  { %6689 = vmatprep.subr.mxu1 %v8819_v0 }
 0x2bb   :  { %v7695_v19 = vpop.permute.xlu1 %373 }
 0x2bc   :  { %2136 = vrot.lane.b32.xlu1 %v7687_v17, %s7379_s24  ;;  %2060 = vrot.lane.b32.xlu0 %v7685_v16, %s7379_s24  ;;  %v7701_v22 = vpop.permute.xlu0 %377 }
 0x2bd   :  { %6687 = vmatmul.mubr.msk.f32.vlgmr.msra.gmra.mrb[0].mxu1 %vm389_vm2, %v7572_v58 }
 0x2be   :  { %6691 = vmatprep.mubr.msk.f32.mxu1 %vm7377_vm1, %v8819_v0 }
 0x2bf   :  { %v7707_v23 = vpop.permute.xlu1 %375 }
 0x2c0   :  { %2288 = vrot.lane.b32.xlu1 %v7695_v19, %s7379_s24  ;;  %2212 = vrot.lane.b32.xlu0 %v7677_v14, %s7379_s24  ;;  %v7713_v24 = vpop.permute.xlu0 %379 }
 0x2c3   :  { %v465_v25 = vpop.permute.xlu1 %464 }
 0x2c4   :  { %2364 = vrot.lane.b32.xlu0 %v7707_v23, %s7379_s24  ;;  %6690 = vmatpush3.xpose.msk.msra.mxu1 %vm389_vm2, %v465_v25  ;;  %v541_v26 = vpop.permute.xlu0 %540 }
 0x2c5   :  { %2440 = vrot.lane.b32.xlu1 %v7701_v22, %s7379_s24  ;;  %6694 = vmatprep.subr.mxu1 %v8819_v0 }
 0x2c7   :  { %v7721_v27 = vpop.permute.xlu1 %381  ;;  %6692 = vmatmul.mubr.msk.f32.vlgmr.msra.gmra.mrb[2].mxu1 %vm389_vm2, %v7569_v48 }
 0x2c8   :  { %2516 = vrot.lane.b32.xlu0 %v7713_v24, %s7379_s24  ;;  %6695 = vmatpush3.xpose.msk.msra.mxu1 %vm389_vm2, %v541_v26  ;;  %v7737_v31 = vpop.permute.xlu0 %385 }
 0x2c9   :  { %2592 = vrot.lane.b32.xlu1 %v7721_v27, %s7379_s24  ;;  %6696 = vmatprep.mubr.msk.f32.mxu1 %vm7377_vm1, %v8819_v0 }
 0x2ca   :  { %6699 = vmatprep.subr.mxu1 %v8819_v0 }
 0x2cb   :  { %v7733_v30 = vpop.permute.xlu1 %383  ;;  %6697 = vmatmul.mubr.msk.f32.vlgmr.msra.gmra.mrb[4].mxu1 %vm389_vm2, %v7578_v49 }
 0x2cc   :  { %2668 = vrot.lane.b32.xlu0 %v7733_v30, %s7379_s24  ;;  %6701 = vmatprep.mubr.msk.f32.mxu1 %vm7377_vm1, %v8819_v0  ;;  %v693_v33 = vpop.permute.xlu0 %692 }
 0x2cd   :  { %2744 = vrot.lane.b32.xlu1 %v7737_v31, %s7379_s24 }
 0x2cf   :  { %v617_v32 = vpop.permute.xlu1 %616 }
 0x2d0   :  { %3204 = vrot.lane.b32.xlu0 %v7572_v58, %s7380_s25  ;;  %6700 = vmatpush3.xpose.msk.msra.mxu1 %vm389_vm2, %v617_v32  ;;  %v845_v20 = vpop.permute.xlu0 %844 }
 0x2d1   :  { %3280 = vrot.lane.b32.xlu1 %v7569_v48, %s7380_s25  ;;  %6704 = vmatprep.subr.mxu1 %v8819_v0 }
 0x2d3   :  { %v769_v34 = vpop.permute.xlu1 %768  ;;  %6702 = vmatmul.mubr.msk.f32.vlgmr.msra.gmra.mrb[6].mxu1 %vm389_vm2, %v7575_v59 }
 0x2d4   :  { %6710 = vmatpush3.xpose.msk.msra.mxu0 %vm389_vm2, %v769_v34  ;;  %3356 = vrot.lane.b32.xlu0 %v7578_v49, %s7380_s25 }
 0x2d5   :  { %3432 = vrot.lane.b32.xlu1 %v7575_v59, %s7380_s25  ;;  %6705 = vmatpush3.xpose.msk.msra.mxu1 %vm389_vm2, %v693_v33 }
 0x2d6   :  { %6706 = vmatprep.mubr.msk.f32.mxu1 %vm7377_vm1, %v8819_v0  ;;  %6719 = vmatprep.subr.mxu0 %v8819_v0 }
 0x2d7   :  { %6712 = vmatmul.mubr.msk.f32.vlgmr.msra.gmra.mrb[8].mxu0 %vm389_vm2, %v7581_v60  ;;  %v921_v35 = vpop.permute.xlu1 %920  ;;  %6714 = vmatprep.subr.mxu1 %v8819_v0 }
 0x2d8   :  { %6707 = vmatmul.mubr.msk.f32.vlgmr.msra.gmra.mrb[8].mxu1 %vm389_vm2, %v7584_v61  ;;  %6720 = vmatpush3.xpose.msk.msra.mxu0 %vm389_vm2, %v921_v35 }
 0x2d9   :  { %3508 = vrot.lane.b32.xlu0 %v7584_v61, %s7380_s25  ;;  %3584 = vrot.lane.b32.xlu1 %v7581_v60, %s7380_s25 }
 0x2da   :  { %6715 = vmatpush3.xpose.msk.msra.mxu1 %vm389_vm2, %v845_v20  ;;  %6716 = vmatprep.mubr.msk.f32.mxu1 %vm7377_vm1, %v8819_v0 }
 0x2db   :  { %6721 = vmatprep.mubr.msk.f32.mxu0 %vm7377_vm1, %v8819_v0  ;;  %6729 = vmatprep.subr.mxu0 %v8819_v0 }
 0x2dc   :  { %6722 = vmatmul.mubr.msk.f32.vlgmr.msra.gmra.mrb[10].mxu0 %vm389_vm2, %v7587_v62  ;;  %6724 = vmatprep.subr.mxu1 %v8819_v0 }
 0x2dd   :  { %6717 = vmatmul.mubr.msk.f32.vlgmr.msra.gmra.mrb[10].mxu1 %vm389_vm2, %v7590_v63  ;;  %3660 = vrot.lane.b32.xlu0 %v7590_v63, %s7380_s25 }
 0x2de   :  { %3736 = vrot.lane.b32.xlu1 %v7587_v62, %s7380_s25  ;;  %6731 = vmatprep.mubr.msk.f32.mxu0 %vm7377_vm1, %v8819_v0 }
 0x2df   :  { %6726 = vmatprep.mubr.msk.f32.mxu1 %vm7377_vm1, %v8819_v0 }
 0x2e1   :  { %3812 = vrot.lane.b32.xlu0 %v7635_v2, %s7380_s25 }
 0x2e2   :  { %3888 = vrot.lane.b32.xlu1 %v7631_v1, %s7380_s25 }
 0x2e5   :  { %3964 = vrot.lane.b32.xlu0 %v7649_v7, %s7380_s25 }
 0x2e6   :  { %4040 = vrot.lane.b32.xlu1 %v7643_v5, %s7380_s25 }
 0x2e9   :  { %4116 = vrot.lane.b32.xlu0 %v7647_v6, %s7380_s25 }
 0x2ea   :  { %4192 = vrot.lane.b32.xlu1 %v7655_v9, %s7380_s25 }
 0x2ed   :  { %4420 = vrot.lane.b32.xlu0 %v7641_v4, %s7380_s25 }
 0x2ee   :  { %4344 = vrot.lane.b32.xlu1 %v7663_v11, %s7380_s25 }
 0x2f1   :  { %4572 = vrot.lane.b32.xlu0 %v7661_v10, %s7380_s25 }
 0x2f2   :  { %4496 = vrot.lane.b32.xlu1 %v7639_v3, %s7380_s25 }
 0x2f5   :  { %5028 = vrot.lane.b32.xlu0 %v7677_v14, %s7380_s25 }
 0x2f6   :  { %4648 = vrot.lane.b32.xlu1 %v7671_v13, %s7380_s25 }
 0x2f9   :  { %5180 = vrot.lane.b32.xlu0 %v7707_v23, %s7380_s25 }
 0x2fa   :  { %4724 = vrot.lane.b32.xlu1 %v7669_v12, %s7380_s25 }
 0x2fd   :  { %4268 = vrot.lane.b32.xlu0 %v7653_v8, %s7380_s25 }
 0x2fe   :  { %4800 = vrot.lane.b32.xlu1 %v7679_v15, %s7380_s25 }
 0x301   :  { %4876 = vrot.lane.b32.xlu0 %v7685_v16, %s7380_s25 }
 0x302   :  { %4952 = vrot.lane.b32.xlu1 %v7687_v17, %s7380_s25 }
 0x306   :  { %5104 = vrot.lane.b32.xlu1 %v7695_v19, %s7380_s25 }
 0x30a   :  { %5256 = vrot.lane.b32.xlu1 %v7701_v22, %s7380_s25  ;;  %v1073_v36 = vpop.permute.xlu1 %1072 }
 0x30b   :  { %6730 = vmatpush3.xpose.msk.msra.mxu0 %vm389_vm2, %v1073_v36  ;;  %v997_v37 = vpop.permute.xlu0 %996 }
 0x30c   :  { %6725 = vmatpush3.xpose.msk.msra.mxu1 %vm389_vm2, %v997_v37  ;;  %6739 = vmatprep.subr.mxu0 %v8819_v0 }
 0x30d   :  { %6734 = vmatprep.subr.mxu1 %v8819_v0 }
 0x30e   :  { %6732 = vmatmul.mubr.msk.f32.vlgmr.msra.gmra.mrb[12].mxu0 %vm389_vm2, %v7631_v1 }
 0x30f   :  { %6727 = vmatmul.mubr.msk.f32.vlgmr.msra.gmra.mrb[12].mxu1 %vm389_vm2, %v7635_v2  ;;  %6741 = vmatprep.mubr.msk.f32.mxu0 %vm7377_vm1, %v8819_v0 }
 0x310   :  { %6736 = vmatprep.mubr.msk.f32.mxu1 %vm7377_vm1, %v8819_v0 }
 0x312   :  { %v1225_v40 = vpop.permute.xlu1 %1224 }
 0x313   :  { %6740 = vmatpush3.xpose.msk.msra.mxu0 %vm389_vm2, %v1225_v40 }
 0x314   :  { %6749 = vmatprep.subr.mxu0 %v8819_v0 }
 0x316   :  { %6742 = vmatmul.mubr.msk.f32.vlgmr.msra.gmra.mrb[14].mxu0 %vm389_vm2, %v7643_v5  ;;  %v1149_v41 = vpop.permute.xlu0 %1148 }
 0x317   :  { %6735 = vmatpush3.xpose.msk.msra.mxu1 %vm389_vm2, %v1149_v41  ;;  %6751 = vmatprep.mubr.msk.f32.mxu0 %vm7377_vm1, %v8819_v0 }
 0x318   :  { %6744 = vmatprep.subr.mxu1 %v8819_v0 }
 0x31a   :  { %v1377_v42 = vpop.permute.xlu1 %1376  ;;  %6737 = vmatmul.mubr.msk.f32.vlgmr.msra.gmra.mrb[14].mxu1 %vm389_vm2, %v7649_v7  ;;  %v1301_v43 = vpop.permute.xlu0 %1300 }
 0x31b   :  { %6745 = vmatpush3.xpose.msk.msra.mxu1 %vm389_vm2, %v1301_v43  ;;  %6750 = vmatpush3.xpose.msk.msra.mxu0 %vm389_vm2, %v1377_v42 }
 0x31c   :  { %6746 = vmatprep.mubr.msk.f32.mxu1 %vm7377_vm1, %v8819_v0  ;;  %6759 = vmatprep.subr.mxu0 %v8819_v0 }
 0x31d   :  { %6754 = vmatprep.subr.mxu1 %v8819_v0 }
 0x31e   :  { %6752 = vmatmul.mubr.msk.f32.vlgmr.msra.gmra.mrb[16].mxu0 %vm389_vm2, %v7655_v9  ;;  %v1529_v44 = vpop.permute.xlu1 %1528  ;;  %6747 = vmatmul.mubr.msk.f32.vlgmr.msra.gmra.mrb[16].mxu1 %vm389_vm2, %v7647_v6  ;;  %v1453_v45 = vpop.permute.xlu0 %1452 }
 0x31f   :  { %6755 = vmatpush3.xpose.msk.msra.mxu1 %vm389_vm2, %v1453_v45  ;;  %6760 = vmatpush3.xpose.msk.msra.mxu0 %vm389_vm2, %v1529_v44 }
 0x320   :  { %6756 = vmatprep.mubr.msk.f32.mxu1 %vm7377_vm1, %v8819_v0  ;;  %6761 = vmatprep.mubr.msk.f32.mxu0 %vm7377_vm1, %v8819_v0 }
 0x321   :  { %6769 = vmatprep.subr.mxu0 %v8819_v0  ;;  %6764 = vmatprep.subr.mxu1 %v8819_v0 }
 0x322   :  { %6762 = vmatmul.mubr.msk.f32.vlgmr.msra.gmra.mrb[18].mxu0 %vm389_vm2, %v7663_v11  ;;  %v1681_v46 = vpop.permute.xlu1 %1680  ;;  %6757 = vmatmul.mubr.msk.f32.vlgmr.msra.gmra.mrb[18].mxu1 %vm389_vm2, %v7653_v8  ;;  %v1605_v28 = vpop.permute.xlu0 %1604 }
 0x323   :  { %6765 = vmatpush3.xpose.msk.msra.mxu1 %vm389_vm2, %v1605_v28  ;;  %6770 = vmatpush3.xpose.msk.msra.mxu0 %vm389_vm2, %v1681_v46 }
 0x324   :  { %6766 = vmatprep.mubr.msk.f32.mxu1 %vm7377_vm1, %v8819_v0  ;;  %6771 = vmatprep.mubr.msk.f32.mxu0 %vm7377_vm1, %v8819_v0 }
 0x325   :  { %6779 = vmatprep.subr.mxu0 %v8819_v0  ;;  %6774 = vmatprep.subr.mxu1 %v8819_v0 }
 0x326   :  { %6772 = vmatmul.mubr.msk.f32.vlgmr.msra.gmra.mrb[20].mxu0 %vm389_vm2, %v7639_v3  ;;  %v1833_v21 = vpop.permute.xlu1 %1832  ;;  %6767 = vmatmul.mubr.msk.f32.vlgmr.msra.gmra.mrb[20].mxu1 %vm389_vm2, %v7641_v4  ;;  %v1757_v47 = vpop.permute.xlu0 %1756 }
 0x327   :  { %6775 = vmatpush3.xpose.msk.msra.mxu1 %vm389_vm2, %v1757_v47  ;;  %6780 = vmatpush3.xpose.msk.msra.mxu0 %vm389_vm2, %v1833_v21 }
 0x328   :  { %6776 = vmatprep.mubr.msk.f32.mxu1 %vm7377_vm1, %v8819_v0  ;;  %6781 = vmatprep.mubr.msk.f32.mxu0 %vm7377_vm1, %v8819_v0 }
 0x329   :  { %6789 = vmatprep.subr.mxu0 %v8819_v0  ;;  %6784 = vmatprep.subr.mxu1 %v8819_v0 }
 0x32a   :  { %6782 = vmatmul.mubr.msk.f32.vlgmr.msra.gmra.mrb[22].mxu0 %vm389_vm2, %v7671_v13  ;;  %v1985_v50 = vpop.permute.xlu1 %1984  ;;  %6777 = vmatmul.mubr.msk.f32.vlgmr.msra.gmra.mrb[22].mxu1 %vm389_vm2, %v7661_v10  ;;  %v1909_v51 = vpop.permute.xlu0 %1908 }
 0x32b   :  { %6785 = vmatpush3.xpose.msk.msra.mxu1 %vm389_vm2, %v1909_v51  ;;  %6790 = vmatpush3.xpose.msk.msra.mxu0 %vm389_vm2, %v1985_v50 }
 0x32c   :  { %6786 = vmatprep.mubr.msk.f32.mxu1 %vm7377_vm1, %v8819_v0  ;;  %6791 = vmatprep.mubr.msk.f32.mxu0 %vm7377_vm1, %v8819_v0 }
 0x32d   :  { %6799 = vmatprep.subr.mxu0 %v8819_v0  ;;  %6794 = vmatprep.subr.mxu1 %v8819_v0 }
 0x32e   :  { %6792 = vmatmul.mubr.msk.f32.vlgmr.msra.gmra.mrb[24].mxu0 %vm389_vm2, %v7679_v15  ;;  %v2137_v52 = vpop.permute.xlu1 %2136  ;;  %6787 = vmatmul.mubr.msk.f32.vlgmr.msra.gmra.mrb[24].mxu1 %vm389_vm2, %v7669_v12  ;;  %v2061_v29 = vpop.permute.xlu0 %2060 }
 0x32f   :  { %6795 = vmatpush3.xpose.msk.msra.mxu1 %vm389_vm2, %v2061_v29  ;;  %6800 = vmatpush3.xpose.msk.msra.mxu0 %vm389_vm2, %v2137_v52 }
 0x330   :  { %6796 = vmatprep.mubr.msk.f32.mxu1 %vm7377_vm1, %v8819_v0  ;;  %6801 = vmatprep.mubr.msk.f32.mxu0 %vm7377_vm1, %v8819_v0 }
 0x331   :  { %6809 = vmatprep.subr.mxu0 %v8819_v0  ;;  %6804 = vmatprep.subr.mxu1 %v8819_v0 }
 0x332   :  { %6802 = vmatmul.mubr.msk.f32.vlgmr.msra.gmra.mrb[26].mxu0 %vm389_vm2, %v7687_v17  ;;  %v2289_v53 = vpop.permute.xlu1 %2288  ;;  %6797 = vmatmul.mubr.msk.f32.vlgmr.msra.gmra.mrb[26].mxu1 %vm389_vm2, %v7685_v16  ;;  %v2213_v38 = vpop.permute.xlu0 %2212 }
 0x333   :  { %6805 = vmatpush3.xpose.msk.msra.mxu1 %vm389_vm2, %v2213_v38  ;;  %6810 = vmatpush3.xpose.msk.msra.mxu0 %vm389_vm2, %v2289_v53 }
 0x334   :  { %6806 = vmatprep.mubr.msk.f32.mxu1 %vm7377_vm1, %v8819_v0  ;;  %6811 = vmatprep.mubr.msk.f32.mxu0 %vm7377_vm1, %v8819_v0 }
 0x335   :  { %6819 = vmatprep.subr.mxu0 %v8819_v0  ;;  %6814 = vmatprep.subr.mxu1 %v8819_v0 }
 0x336   :  { %6812 = vmatmul.mubr.msk.f32.vlgmr.msra.gmra.mrb[28].mxu0 %vm389_vm2, %v7695_v19  ;;  %6807 = vmatmul.mubr.msk.f32.vlgmr.msra.gmra.mrb[28].mxu1 %vm389_vm2, %v7677_v14  ;;  %v2365_v54 = vpop.permute.xlu0 %2364 }
 0x337   :  { %v2441_v55 = vpop.permute.xlu1 %2440  ;;  %6815 = vmatpush3.xpose.msk.msra.mxu1 %vm389_vm2, %v2365_v54  ;;  %6816 = vmatprep.mubr.msk.f32.mxu1 %vm7377_vm1, %v8819_v0 }
 0x338   :  { %6820 = vmatpush3.xpose.msk.msra.mxu0 %vm389_vm2, %v2441_v55  ;;  %6821 = vmatprep.mubr.msk.f32.mxu0 %vm7377_vm1, %v8819_v0 }
 0x339   :  { %6829 = vmatprep.subr.mxu0 %v8819_v0  ;;  %6824 = vmatprep.subr.mxu1 %v8819_v0 }
 0x33a   :  { %6817 = vmatmul.mubr.msk.f32.vlgmr.msra.gmra.mrb[30].mxu1 %vm389_vm2, %v7707_v23  ;;  %v2517_v56 = vpop.permute.xlu0 %2516 }
 0x33b   :  { %6822 = vmatmul.mubr.msk.f32.vlgmr.msra.gmra.mrb[30].mxu0 %vm389_vm2, %v7701_v22  ;;  %v2593_v57 = vpop.permute.xlu1 %2592  ;;  %6825 = vmatpush3.xpose.msk.msra.mxu1 %vm389_vm2, %v2517_v56 }
 0x33c   :  { %6830 = vmatpush3.xpose.msk.msra.mxu0 %vm389_vm2, %v2593_v57  ;;  %6826 = vmatprep.mubr.msk.f32.mxu1 %vm7377_vm1, %v8819_v0 }
 0x33d   :  { %6831 = vmatprep.mubr.msk.f32.mxu0 %vm7377_vm1, %v8819_v0  ;;  %6839 = vmatprep.subr.mxu0 %v8819_v0 }
 0x33e   :  { %6827 = vmatmul.mubr.msk.f32.vlgmr.msra.gmra.mrb[32].mxu1 %vm389_vm2, %v7713_v24  ;;  %6834 = vmatprep.subr.mxu1 %v8819_v0  ;;  %v2669_v39 = vpop.permute.xlu0 %2668 }
 0x33f   :  { %6832 = vmatmul.mubr.msk.f32.vlgmr.msra.gmra.mrb[32].mxu0 %vm389_vm2, %v7721_v27  ;;  %v2745_v48 = vpop.permute.xlu1 %2744  ;;  %6835 = vmatpush3.xpose.msk.msra.mxu1 %vm389_vm2, %v2669_v39 }
 0x340   :  { %6840 = vmatpush3.xpose.msk.msra.mxu0 %vm389_vm2, %v2745_v48  ;;  %6836 = vmatprep.mubr.msk.f32.mxu1 %vm7377_vm1, %v8819_v0 }
 0x341   :  { %6841 = vmatprep.mubr.msk.f32.mxu0 %vm7377_vm1, %v8819_v0  ;;  %6849 = vmatprep.subr.mxu0 %v8819_v0 }
 0x342   :  { %6837 = vmatmul.mubr.msk.f32.vlgmr.msra.gmra.mrb[34].mxu1 %vm389_vm2, %v7733_v30  ;;  %6844 = vmatprep.subr.mxu1 %v8819_v0  ;;  %v3205_v58 = vpop.permute.xlu0 %3204 }
 0x343   :  { %6842 = vmatmul.mubr.msk.f32.vlgmr.msra.gmra.mrb[34].mxu0 %vm389_vm2, %v7737_v31  ;;  %v3281_v59 = vpop.permute.xlu1 %3280  ;;  %6845 = vmatpush3.msra.mxu1 %v3205_v58 }
 0x344   :  { %6850 = vmatpush3.msra.mxu0 %v3281_v59  ;;  %6846 = vmatprep.mubr.msk.f32.mxu1 %vm7377_vm1, %v8819_v0 }
 0x345   :  { %6854 = vmatprep.subr.mxu1 %v8819_v0  ;;  %6851 = vmatprep.mubr.msk.f32.mxu0 %vm7377_vm1, %v8819_v0 }
 0x346   :  { %6859 = vmatprep.subr.mxu0 %v8819_v0  ;;  %v8009_v20 = vpop.permute.xlu0 %3356 }
 0x347   :  { %v8013_v37 = vpop.permute.xlu1 %3432 }
 0x34b   :  { %v8011_v36 = vpop.permute.xlu0 %3508  ;;  %v8021_v28 = vpop.permute.xlu1 %3584 }
 0x34f   :  { %v8015_v40 = vpop.permute.xlu0 %3660 }
 0x350   :  { %v8029_v52 = vpop.permute.xlu1 %3736 }
 0x353   :  { %v8027_v50 = vpop.permute.xlu0 %3812 }
 0x354   :  { %v8039_v39 = vpop.permute.xlu1 %3888 }
 0x357   :  { %v8035_v55 = vpop.permute.xlu0 %3964 }
 0x390   :  { %v460_v49 = vpop.f32.mrb[0].mxu1 }
 0x391   :  { %v7977_v60 = vmul.f32 0.35355338, %v460_v49  ;;  %v6688_v61 = vpop.f32.mrb[1].mxu1 }
 0x393   :  { %v2852_v62 = vsel %vm389_vm2, %v7977_v60, -inf }
 0x394   :  { %2853 = vmax.xlane.f32.xlu0 %v2852_v62 }
 0x39a   :  { %v536_v63 = vpop.f32.mrb[2].mxu1 }
 0x39b   :  { %v7981_v1 = vmul.f32 0.35355338, %v536_v63  ;;  %v6693_v2 = vpop.f32.mrb[3].mxu1 }
 0x39c   :  { %v8047_v2 = vpop.permute.xlu0 %4116 }
 0x39d   :  { %v2855_v3 = vsel %vm389_vm2, %v7981_v1, -inf }
 0x39e   :  { %v612_v4 = vpop.f32.mrb[4].mxu1  ;;  %2856 = vmax.xlane.f32.xlu1 %v2855_v3 }
 0x39f   :  { %v7985_v5 = vmul.f32 0.35355338, %v612_v4  ;;  %v6698_v6 = vpop.f32.mrb[5].mxu1 }
 0x3a1   :  { %v2858_v7 = vsel %vm389_vm2, %v7985_v5, -inf }
 0x3a2   :  { %2859 = vmax.xlane.f32.xlu0 %v2858_v7 }
 0x3a6   :  { %v688_v8 = vpop.f32.mrb[6].mxu1 }
 0x3a7   :  { %v7989_v9 = vmul.f32 0.35355338, %v688_v8  ;;  %v6703_v10 = vpop.f32.mrb[7].mxu1 }
 0x3a9   :  { %v2861_v11 = vsel %vm389_vm2, %v7989_v9, -inf }
 0x3aa   :  { %v840_v12 = vpop.f32.mrb[8].mxu0  ;;  %2862 = vmax.xlane.f32.xlu0 %v2861_v11 }
 0x3ab   :  { %v7993_v13 = vmul.f32 0.35355338, %v840_v12  ;;  %v764_v14 = vpop.f32.mrb[8].mxu1  ;;  %v6713_v15 = vpop.f32.mrb[9].mxu0 }
 0x3ac   :  { %v7995_v16 = vmul.f32 0.35355338, %v764_v14  ;;  %v6708_v17 = vpop.f32.mrb[9].mxu1  ;;  %v8057_v14 = vpop.permute.xlu1 %4040 }
 0x3ad   :  { %v2867_v18 = vsel %vm389_vm2, %v7993_v13, -inf }
 0x3ae   :  { %2868 = vmax.xlane.f32.xlu1 %v2867_v18  ;;  %v2864_v19 = vsel %vm389_vm2, %v7995_v16, -inf }
 0x3af   :  { %v992_v22 = vpop.f32.mrb[10].mxu0  ;;  %2865 = vmax.xlane.f32.xlu0 %v2864_v19 }
 0x3b0   :  { %v8001_v23 = vmul.f32 0.35355338, %v992_v22  ;;  %v916_v25 = vpop.f32.mrb[10].mxu1  ;;  %v6723_v26 = vpop.f32.mrb[11].mxu0 }
 0x3b1   :  { %v8003_v32 = vmul.f32 0.35355338, %v916_v25  ;;  %v6718_v33 = vpop.f32.mrb[11].mxu1 }
 0x3b2   :  { %v2873_v34 = vsel %vm389_vm2, %v8001_v23, -inf }
 0x3b3   :  { %2874 = vmax.xlane.f32.xlu1 %v2873_v34  ;;  %v2870_v35 = vsel %vm389_vm2, %v8003_v32, -inf  ;;  %v8067_v34 = vpop.permute.xlu0 %4420 }
 0x3b4   :  { %2871 = vmax.xlane.f32.xlu0 %v2870_v35 }
 0x3e1   :  { %v1144_v41 = vpop.f32.mrb[12].mxu0 }
 0x3e2   :  { %v8017_v42 = vmul.f32 0.35355338, %v1144_v41  ;;  %v1068_v43 = vpop.f32.mrb[12].mxu1  ;;  %v6733_v44 = vpop.f32.mrb[13].mxu0 }
 0x3e3   :  { %v8019_v45 = vmul.f32 0.35355338, %v1068_v43  ;;  %v6728_v46 = vpop.f32.mrb[13].mxu1 }
 0x3e4   :  { %v2879_v21 = vsel %vm389_vm2, %v8017_v42, -inf }
 0x3e5   :  { %2880 = vmax.xlane.f32.xlu1 %v2879_v21  ;;  %v2876_v47 = vsel %vm389_vm2, %v8019_v45, -inf }
 0x3e6   :  { %2877 = vmax.xlane.f32.xlu0 %v2876_v47 }
 0x3e9   :  { %v1296_v51 = vpop.f32.mrb[14].mxu0 }
 0x3ea   :  { %v8031_v29 = vmul.f32 0.35355338, %v1296_v51  ;;  %v6743_v53 = vpop.f32.mrb[15].mxu0 }
 0x3eb   :  { %v8077_v53 = vpop.permute.xlu1 %4192 }
 0x3ec   :  { %v2885_v38 = vsel %vm389_vm2, %v8031_v29, -inf }
 0x3ed   :  { %2886 = vmax.xlane.f32.xlu1 %v2885_v38  ;;  %v1220_v54 = vpop.f32.mrb[14].mxu1 }
 0x3ee   :  { %v8037_v56 = vmul.f32 0.35355338, %v1220_v54  ;;  %v6738_v57 = vpop.f32.mrb[15].mxu1 }
 0x3f0   :  { %v2882_v48 = vsel %vm389_vm2, %v8037_v56, -inf }
 0x3f1   :  { %v1448_v58 = vpop.f32.mrb[16].mxu0  ;;  %2883 = vmax.xlane.f32.xlu0 %v2882_v48  ;;  %v1372_v59 = vpop.f32.mrb[16].mxu1 }
 0x3f2   :  { %v8043_v49 = vmul.f32 0.35355338, %v1448_v58  ;;  %v8045_v61 = vmul.f32 0.35355338, %v1372_v59  ;;  %v6748_v62 = vpop.f32.mrb[17].mxu1  ;;  %v6753_v63 = vpop.f32.mrb[17].mxu0 }
 0x3f4   :  { %v2891_v3 = vsel %vm389_vm2, %v8043_v49, -inf  ;;  %v2888_v4 = vsel %vm389_vm2, %v8045_v61, -inf }
 0x3f5   :  { %v1600_v6 = vpop.f32.mrb[18].mxu0  ;;  %2892 = vmax.xlane.f32.xlu1 %v2891_v3  ;;  %2889 = vmax.xlane.f32.xlu0 %v2888_v4  ;;  %v1524_v7 = vpop.f32.mrb[18].mxu1 }
 0x3f6   :  { %v8053_v8 = vmul.f32 0.35355338, %v1600_v6  ;;  %v8055_v10 = vmul.f32 0.35355338, %v1524_v7  ;;  %v6758_v11 = vpop.f32.mrb[19].mxu1  ;;  %v6763_v12 = vpop.f32.mrb[19].mxu0 }
 0x3f7   :  { %v8087_v3 = vpop.permute.xlu0 %4572 }
 0x3f8   :  { %v2897_v15 = vsel %vm389_vm2, %v8053_v8, -inf  ;;  %v2894_v17 = vsel %vm389_vm2, %v8055_v10, -inf  ;;  %8821 = vst [vmem:[#allocation8_spill] sm:$0xff] %v8087_v3 }
 0x3f9   :  { %v1752_v18 = vpop.f32.mrb[20].mxu0  ;;  %2898 = vmax.xlane.f32.xlu1 %v2897_v15  ;;  %2895 = vmax.xlane.f32.xlu0 %v2894_v17  ;;  %v1676_v19 = vpop.f32.mrb[20].mxu1 }
 0x3fa   :  { %v8063_v22 = vmul.f32 0.35355338, %v1752_v18  ;;  %v8065_v25 = vmul.f32 0.35355338, %v1676_v19  ;;  %v6768_v26 = vpop.f32.mrb[21].mxu1  ;;  %v6773_v33 = vpop.f32.mrb[21].mxu0 }
 0x3fb   :  { %v8097_v19 = vpop.permute.xlu1 %4344 }
 0x3fc   :  { %v2903_v35 = vsel %vm389_vm2, %v8063_v22, -inf  ;;  %v2900_v41 = vsel %vm389_vm2, %v8065_v25, -inf }
 0x3fd   :  { %v1904_v43 = vpop.f32.mrb[22].mxu0  ;;  %2904 = vmax.xlane.f32.xlu1 %v2903_v35  ;;  %2901 = vmax.xlane.f32.xlu0 %v2900_v41  ;;  %v1828_v44 = vpop.f32.mrb[22].mxu1 }
 0x3fe   :  { %v8073_v46 = vmul.f32 0.35355338, %v1904_v43  ;;  %v8075_v21 = vmul.f32 0.35355338, %v1828_v44  ;;  %v6778_v47 = vpop.f32.mrb[23].mxu1  ;;  %v6783_v51 = vpop.f32.mrb[23].mxu0 }
 0x400   :  { %v2909_v38 = vsel %vm389_vm2, %v8073_v46, -inf  ;;  %v2906_v54 = vsel %vm389_vm2, %v8075_v21, -inf }
 0x401   :  { %v2056_v57 = vpop.f32.mrb[24].mxu0  ;;  %2910 = vmax.xlane.f32.xlu1 %v2909_v38  ;;  %2907 = vmax.xlane.f32.xlu0 %v2906_v54  ;;  %v1980_v48 = vpop.f32.mrb[24].mxu1 }
 0x402   :  { %v8083_v58 = vmul.f32 0.35355338, %v2056_v57  ;;  %v8085_v59 = vmul.f32 0.35355338, %v1980_v48  ;;  %v6788_v62 = vpop.f32.mrb[25].mxu1  ;;  %v6793_v63 = vpop.f32.mrb[25].mxu0 }
 0x403   :  { %v8107_v38 = vpop.permute.xlu0 %5028  ;;  %v8113_v48 = vpop.permute.xlu1 %4496 }
 0x404   :  { %v2915_v4 = vsel %vm389_vm2, %v8083_v58, -inf  ;;  %v2912_v6 = vsel %vm389_vm2, %v8085_v59, -inf  ;;  %8822 = vst [vmem:[#allocation9_spill] sm:$0xff] %v8107_v38  ;;  %8823 = vst [vmem:[#allocation10_spill] sm:$0xff] %v8113_v48 }
 0x405   :  { %v2208_v7 = vpop.f32.mrb[26].mxu0  ;;  %2916 = vmax.xlane.f32.xlu1 %v2915_v4  ;;  %2913 = vmax.xlane.f32.xlu0 %v2912_v6  ;;  %v2132_v11 = vpop.f32.mrb[26].mxu1 }
 0x406   :  { %v8093_v12 = vmul.f32 0.35355338, %v2208_v7  ;;  %v8095_v15 = vmul.f32 0.35355338, %v2132_v11  ;;  %v6798_v17 = vpop.f32.mrb[27].mxu1  ;;  %v6803_v18 = vpop.f32.mrb[27].mxu0 }
 0x407   :  { %v8121_v18 = vpop.permute.xlu0 %5180 }
 0x408   :  { %v2921_v26 = vsel %vm389_vm2, %v8093_v12, -inf  ;;  %v2918_v33 = vsel %vm389_vm2, %v8095_v15, -inf  ;;  %8824 = vst [vmem:[#allocation11_spill] sm:$0xff] %v8121_v18 }
 0x409   :  { %v2360_v35 = vpop.f32.mrb[28].mxu0  ;;  %2922 = vmax.xlane.f32.xlu1 %v2921_v26  ;;  %2919 = vmax.xlane.f32.xlu0 %v2918_v33  ;;  %v2284_v41 = vpop.f32.mrb[28].mxu1 }
 0x40a   :  { %v8103_v43 = vmul.f32 0.35355338, %v2360_v35  ;;  %v8105_v44 = vmul.f32 0.35355338, %v2284_v41  ;;  %v6808_v47 = vpop.f32.mrb[29].mxu1  ;;  %v6813_v51 = vpop.f32.mrb[29].mxu0 }
 0x40c   :  { %v2927_v54 = vsel %vm389_vm2, %v8103_v43, -inf  ;;  %v2924_v57 = vsel %vm389_vm2, %v8105_v44, -inf }
 0x40d   :  { %2928 = vmax.xlane.f32.xlu1 %v2927_v54  ;;  %2925 = vmax.xlane.f32.xlu0 %v2924_v57  ;;  %v2436_v62 = vpop.f32.mrb[30].mxu1  ;;  %v8129_v57 = vpop.permute.xlu1 %4648 }
 0x40e   :  { %v2512_v63 = vpop.f32.mrb[30].mxu0  ;;  %v8115_v4 = vmul.f32 0.35355338, %v2436_v62  ;;  %v6818_v6 = vpop.f32.mrb[31].mxu1  ;;  %8825 = vst [vmem:[#allocation12_spill] sm:$0xff] %v8129_v57 }
 0x40f   :  { %v8117_v7 = vmul.f32 0.35355338, %v2512_v63  ;;  %v6823_v11 = vpop.f32.mrb[31].mxu0 }
 0x410   :  { %v2930_v17 = vsel %vm389_vm2, %v8115_v4, -inf }
 0x411   :  { %v2933_v26 = vsel %vm389_vm2, %v8117_v7, -inf  ;;  %2931 = vmax.xlane.f32.xlu0 %v2930_v17  ;;  %v2588_v33 = vpop.f32.mrb[32].mxu1 }
 0x412   :  { %v2664_v35 = vpop.f32.mrb[32].mxu0  ;;  %2934 = vmax.xlane.f32.xlu1 %v2933_v26  ;;  %v8125_v41 = vmul.f32 0.35355338, %v2588_v33  ;;  %v6828_v47 = vpop.f32.mrb[33].mxu1 }
 0x413   :  { %v8127_v51 = vmul.f32 0.35355338, %v2664_v35  ;;  %v6833_v54 = vpop.f32.mrb[33].mxu0  ;;  %v8135_v26 = vpop.permute.xlu0 %4268 }
 0x414   :  { %v2936_v62 = vsel %vm389_vm2, %v8125_v41, -inf  ;;  %v8141_v54 = vpop.permute.xlu1 %4724 }
 0x415   :  { %v2939_v63 = vsel %vm389_vm2, %v8127_v51, -inf  ;;  %2937 = vmax.xlane.f32.xlu0 %v2936_v62  ;;  %v2740_v6 = vpop.f32.mrb[34].mxu1  ;;  %8826 = vst [vmem:[#allocation13_spill] sm:$0xff] %v8141_v54 }
 0x416   :  { %2940 = vmax.xlane.f32.xlu1 %v2939_v63  ;;  %v2816_v11 = vpop.f32.mrb[34].mxu0  ;;  %v6838_v17 = vpop.f32.mrb[35].mxu1  ;;  %v8156_v54 = vmul.f32 0.35355338, %v2740_v6 }
 0x417   :  { %v8137_v33 = vmul.f32 0.35355338, %v2816_v11  ;;  %v6843_v35 = vpop.f32.mrb[35].mxu0  ;;  %v8143_v0 = vpop.permute.xlu0 %4876 }
 0x418   :  { %8827 = vst [vmem:[#allocation14_spill] sm:$0xff] %v8143_v0  ;;  %v8145_v18 = vpop.permute.xlu1 %4800 }
 0x419   :  { %v2945_v47 = vsel %vm389_vm2, %v8137_v33, -inf  ;;  %8828 = vst [vmem:[#allocation15_spill] sm:$0xff] %v8145_v18 }
 0x41a   :  { %2946 = vmax.xlane.f32.xlu1 %v2945_v47 }
 0x41c   :  { %v8148_v17 = vpop.permute.xlu1 %4952 }
 0x41d   :  { %8829 = vst [vmem:[#allocation16_spill] sm:$0xff] %v8148_v17 }
 0x420   :  { %v8152_v11 = vpop.permute.xlu1 %5104 }
 0x421   :  { %v2854_v62 = vpop.xlane.xlu0 %2853  ;;  %8830 = vst [vmem:[#allocation17_spill] sm:$0xff] %v8152_v11 }
 0x422   :  { %v2948_v63 = vsub.f32 %v7977_v60, %v2854_v62  ;;  %v2942_v60 = vsel %vm389_vm2, %v8156_v54, -inf }
 0x424   :  { %v2980_v38 = vmul.f32 1.442695, %v2948_v63  ;;  %v8160_v0 = vpop.permute.xlu1 %5256 }
 0x425   :  { %8831 = vst [vmem:[#allocation18_spill] sm:$0xff] %v8160_v0 }
 0x426   :  { %7173 = vpow2.f32 %v2980_v38 }
 0x42b   :  { %5408 = vrot.lane.b32.xlu1 %v7721_v27, %s7380_s25  ;;  %v2857_v62 = vpop.xlane.xlu1 %2856 }
 0x42c   :  { %v2949_v38 = vsub.f32 %v7981_v1, %v2857_v62 }
 0x42e   :  { %v2982_v63 = vmul.f32 1.442695, %v2949_v38 }
 0x42f   :  { %v2860_v17 = vpop.xlane.xlu0 %2859 }
 0x430   :  { %v8154_v35 = vpop.eup %7173  ;;  %7175 = vpow2.f32 %v2982_v63 }
 0x431   :  { %v3044_v47 = vsel %vm389_vm2, %v8154_v35, 0.0 }
 0x432   :  { %3045 = vadd.xlane.f32.xlu0 %v3044_v47 }
 0x436   :  { %2943 = vmax.xlane.f32.xlu0 %v2942_v60 }
 0x437   :  { %v2863_v3 = vpop.xlane.xlu0 %2862 }
 0x438   :  { %v2951_v47 = vsub.f32 %v7989_v9, %v2863_v3 }
 0x43a   :  { %v2986_v48 = vmul.f32 1.442695, %v2951_v47  ;;  %v8168_v60 = vpop.eup %7175 }
 0x43b   :  { %v2869_v27 = vpop.xlane.xlu1 %2868  ;;  %v3047_v1 = vsel %vm389_vm2, %v8168_v60, 0.0 }
 0x43c   :  { %v2953_v11 = vsub.f32 %v7993_v13, %v2869_v27  ;;  %v2866_v3 = vpop.xlane.xlu0 %2865 }
 0x43e   :  { %v2990_v18 = vmul.f32 1.442695, %v2953_v11 }
 0x440   :  { %v2875_v6 = vpop.xlane.xlu1 %2874  ;;  %7177 = vpow2.f32 %v2990_v18 }
 0x441   :  { %v2955_v57 = vsub.f32 %v8001_v23, %v2875_v6  ;;  %v2872_v11 = vpop.xlane.xlu0 %2871 }
 0x442   :  { %v2954_v27 = vsub.f32 %v8003_v32, %v2872_v11 }
 0x443   :  { %v2994_v0 = vmul.f32 1.442695, %v2955_v57  ;;  %v2952_v57 = vsub.f32 %v7995_v16, %v2866_v3 }
 0x445   :  { %7179 = vpow2.f32 %v2994_v0  ;;  %v2950_v0 = vsub.f32 %v7985_v5, %v2860_v17  ;;  %v2988_v38 = vmul.f32 1.442695, %v2952_v57  ;;  %v2992_v5 = vmul.f32 1.442695, %v2954_v27 }
 0x446   :  { %7181 = vpow2.f32 %v2986_v48 }
 0x447   :  { %v2984_v48 = vmul.f32 1.442695, %v2950_v0 }
 0x449   :  { %7183 = vpow2.f32 %v2984_v48 }
 0x44a   :  { %v8174_v13 = vpop.eup %7177  ;;  %7185 = vpow2.f32 %v2988_v38 }
 0x44b   :  { %v3059_v23 = vsel %vm389_vm2, %v8174_v13, 0.0  ;;  %7187 = vpow2.f32 %v2992_v5 }
 0x44c   :  { %5332 = vrot.lane.b32.xlu0 %v7713_v24, %s7380_s25 }
 0x44f   :  { %3048 = vadd.xlane.f32.xlu1 %v3047_v1  ;;  %v8178_v9 = vpop.eup %7179 }
 0x450   :  { %v3065_v18 = vsel %vm389_vm2, %v8178_v9, 0.0  ;;  %v8183_v24 = vpop.eup %7181 }
 0x451   :  { %v3053_v62 = vsel %vm389_vm2, %v8183_v24, 0.0 }
 0x453   :  { %3060 = vadd.xlane.f32.xlu1 %v3059_v23  ;;  %v8189_v17 = vpop.eup %7183 }
 0x454   :  { %v3050_v63 = vsel %vm389_vm2, %v8189_v17, 0.0  ;;  %v8193_v6 = vpop.eup %7185 }
 0x455   :  { %v3056_v16 = vsel %vm389_vm2, %v8193_v6, 0.0  ;;  %v8197_v47 = vpop.eup %7187 }
 0x456   :  { %v3062_v32 = vsel %vm389_vm2, %v8197_v47, 0.0 }
 0x457   :  { %3066 = vadd.xlane.f32.xlu1 %v3065_v18 }
 0x45b   :  { %3054 = vadd.xlane.f32.xlu1 %v3053_v62 }
 0x46b   :  { %3051 = vadd.xlane.f32.xlu0 %v3050_v63 }
 0x46f   :  { %3057 = vadd.xlane.f32.xlu0 %v3056_v16 }
 0x472   :  { %v2881_v1 = vpop.xlane.xlu1 %2880 }
 0x473   :  { %v2957_v23 = vsub.f32 %v8017_v42, %v2881_v1  ;;  %3063 = vadd.xlane.f32.xlu0 %v3062_v32  ;;  %v2878_v3 = vpop.xlane.xlu0 %2877 }
 0x474   :  { %v2956_v0 = vsub.f32 %v8019_v45, %v2878_v3 }
 0x475   :  { %v2998_v18 = vmul.f32 1.442695, %v2957_v23 }
 0x476   :  { %v2996_v48 = vmul.f32 1.442695, %v2956_v0 }
 0x477   :  { %7189 = vpow2.f32 %v2998_v18 }
 0x478   :  { %7191 = vpow2.f32 %v2996_v48 }
 0x47a   :  { %v2887_v57 = vpop.xlane.xlu1 %2886 }
 0x47b   :  { %v2959_v11 = vsub.f32 %v8031_v29, %v2887_v57 }
 0x47d   :  { %v3002_v62 = vmul.f32 1.442695, %v2959_v11 }
 0x47e   :  { %v2884_v38 = vpop.xlane.xlu0 %2883 }
 0x47f   :  { %7193 = vpow2.f32 %v3002_v62  ;;  %v2958_v27 = vsub.f32 %v8037_v56, %v2884_v38 }
 0x481   :  { %v8205_v5 = vpop.eup %7189  ;;  %v3000_v63 = vmul.f32 1.442695, %v2958_v27 }
 0x482   :  { %v8207_v42 = vpop.eup %7191  ;;  %v2893_v16 = vpop.xlane.xlu1 %2892  ;;  %v3071_v45 = vsel %vm389_vm2, %v8205_v5, 0.0 }
 0x483   :  { %v2890_v1 = vpop.xlane.xlu0 %2889  ;;  %7195 = vpow2.f32 %v3000_v63  ;;  %v2961_v32 = vsub.f32 %v8043_v49, %v2893_v16  ;;  %3072 = vadd.xlane.f32.xlu1 %v3071_v45  ;;  %v3068_v23 = vsel %vm389_vm2, %v8207_v42, 0.0 }
 0x484   :  { %v2960_v29 = vsub.f32 %v8045_v61, %v2890_v1  ;;  %3069 = vadd.xlane.f32.xlu0 %v3068_v23 }
 0x485   :  { %v3006_v56 = vmul.f32 1.442695, %v2961_v32 }
 0x486   :  { %v3004_v3 = vmul.f32 1.442695, %v2960_v29  ;;  %v2899_v0 = vpop.xlane.xlu1 %2898 }
 0x487   :  { %v2896_v18 = vpop.xlane.xlu0 %2895  ;;  %7197 = vpow2.f32 %v3006_v56  ;;  %v2963_v48 = vsub.f32 %v8053_v8, %v2899_v0 }
 0x488   :  { %v2962_v57 = vsub.f32 %v8055_v10, %v2896_v18  ;;  %7199 = vpow2.f32 %v3004_v3 }
 0x489   :  { %v8217_v11 = vpop.eup %7193  ;;  %v3010_v49 = vmul.f32 1.442695, %v2963_v48 }
 0x48a   :  { %v3008_v62 = vmul.f32 1.442695, %v2962_v57  ;;  %v2905_v61 = vpop.xlane.xlu1 %2904  ;;  %v3077_v27 = vsel %vm389_vm2, %v8217_v11, 0.0 }
 0x48b   :  { %v2902_v38 = vpop.xlane.xlu0 %2901  ;;  %7201 = vpow2.f32 %v3010_v49  ;;  %v2965_v63 = vsub.f32 %v8063_v22, %v2905_v61  ;;  %3078 = vadd.xlane.f32.xlu1 %v3077_v27 }
 0x48c   :  { %v2964_v16 = vsub.f32 %v8065_v25, %v2902_v38  ;;  %7203 = vpow2.f32 %v3008_v62 }
 0x48d   :  { %v8223_v8 = vpop.eup %7195  ;;  %v3014_v10 = vmul.f32 1.442695, %v2965_v63 }
 0x48e   :  { %v3012_v1 = vmul.f32 1.442695, %v2964_v16  ;;  %v2911_v45 = vpop.xlane.xlu1 %2910  ;;  %v3074_v29 = vsel %vm389_vm2, %v8223_v8, 0.0 }
 0x48f   :  { %v2908_v32 = vpop.xlane.xlu0 %2907  ;;  %7205 = vpow2.f32 %v3014_v10  ;;  %v2967_v23 = vsub.f32 %v8073_v46, %v2911_v45  ;;  %3075 = vadd.xlane.f32.xlu0 %v3074_v29 }
 0x490   :  { %v2966_v56 = vsub.f32 %v8075_v21, %v2908_v32  ;;  %7207 = vpow2.f32 %v3012_v1 }
 0x491   :  { %v8229_v22 = vpop.eup %7197  ;;  %v3018_v25 = vmul.f32 1.442695, %v2967_v23 }
 0x492   :  { %v3016_v3 = vmul.f32 1.442695, %v2966_v56  ;;  %v8231_v0 = vpop.eup %7199  ;;  %v2917_v18 = vpop.xlane.xlu1 %2916  ;;  %v3083_v57 = vsel %vm389_vm2, %v8229_v22, 0.0 }
 0x493   :  { %v2914_v48 = vpop.xlane.xlu0 %2913  ;;  %7209 = vpow2.f32 %v3018_v25  ;;  %v2969_v49 = vsub.f32 %v8083_v58, %v2917_v18  ;;  %3084 = vadd.xlane.f32.xlu1 %v3083_v57  ;;  %v3080_v21 = vsel %vm389_vm2, %v8231_v0, 0.0 }
 0x494   :  { %v2968_v46 = vsub.f32 %v8085_v59, %v2914_v48  ;;  %7211 = vpow2.f32 %v3016_v3  ;;  %3081 = vadd.xlane.f32.xlu0 %v3080_v21 }
 0x495   :  { %v8239_v62 = vpop.eup %7201  ;;  %v3022_v61 = vmul.f32 1.442695, %v2969_v49 }
 0x496   :  { %v3020_v38 = vmul.f32 1.442695, %v2968_v46  ;;  %v8241_v27 = vpop.eup %7203  ;;  %v2923_v63 = vpop.xlane.xlu1 %2922  ;;  %v3089_v10 = vsel %vm389_vm2, %v8239_v62, 0.0 }
 0x497   :  { %v2920_v16 = vpop.xlane.xlu0 %2919  ;;  %7213 = vpow2.f32 %v3022_v61  ;;  %v2971_v58 = vsub.f32 %v8093_v12, %v2923_v63  ;;  %v3086_v1 = vsel %vm389_vm2, %v8241_v27, 0.0 }
 0x498   :  { %v2970_v59 = vsub.f32 %v8095_v15, %v2920_v16  ;;  %7215 = vpow2.f32 %v3020_v38  ;;  %3090 = vadd.xlane.f32.xlu0 %v3089_v10  ;;  %3087 = vadd.xlane.f32.xlu1 %v3086_v1 }
 0x499   :  { %v8249_v45 = vpop.eup %7205  ;;  %v3026_v32 = vmul.f32 1.442695, %v2971_v58 }
 0x49a   :  { %v3024_v29 = vmul.f32 1.442695, %v2970_v59  ;;  %v8251_v23 = vpop.eup %7207  ;;  %v2929_v56 = vpop.xlane.xlu1 %2928  ;;  %v3095_v3 = vsel %vm389_vm2, %v8249_v45, 0.0 }
 0x49b   :  { %v2926_v25 = vpop.xlane.xlu0 %2925  ;;  %7217 = vpow2.f32 %v3026_v32  ;;  %v2973_v12 = vsub.f32 %v8103_v43, %v2929_v56  ;;  %v3092_v18 = vsel %vm389_vm2, %v8251_v23, 0.0 }
 0x49c   :  { %v2972_v15 = vsub.f32 %v8105_v44, %v2926_v25  ;;  %7219 = vpow2.f32 %v3024_v29  ;;  %3096 = vadd.xlane.f32.xlu0 %v3095_v3  ;;  %3093 = vadd.xlane.f32.xlu1 %v3092_v18 }
 0x49d   :  { %v8259_v48 = vpop.eup %7209  ;;  %v3030_v57 = vmul.f32 1.442695, %v2973_v12 }
 0x49e   :  { %v3028_v49 = vmul.f32 1.442695, %v2972_v15  ;;  %v8261_v46 = vpop.eup %7211  ;;  %v3101_v61 = vsel %vm389_vm2, %v8259_v48, 0.0 }
 0x49f   :  { %v2932_v21 = vpop.xlane.xlu0 %2931  ;;  %7221 = vpow2.f32 %v3030_v57  ;;  %v2935_v43 = vpop.xlane.xlu1 %2934  ;;  %v3098_v38 = vsel %vm389_vm2, %v8261_v46, 0.0 }
 0x4a0   :  { %v2974_v44 = vsub.f32 %v8115_v4, %v2932_v21  ;;  %7223 = vpow2.f32 %v3028_v49  ;;  %v2975_v63 = vsub.f32 %v8117_v7, %v2935_v43  ;;  %3102 = vadd.xlane.f32.xlu0 %v3101_v61  ;;  %3099 = vadd.xlane.f32.xlu1 %v3098_v38 }
 0x4a1   :  { %v8269_v16 = vpop.eup %7213 }
 0x4a2   :  { %v3032_v10 = vmul.f32 1.442695, %v2974_v44  ;;  %v8271_v58 = vpop.eup %7215  ;;  %v3034_v59 = vmul.f32 1.442695, %v2975_v63  ;;  %v3107_v32 = vsel %vm389_vm2, %v8269_v16, 0.0 }
 0x4a3   :  { %v2938_v1 = vpop.xlane.xlu0 %2937  ;;  %v2941_v4 = vpop.xlane.xlu1 %2940  ;;  %v3104_v56 = vsel %vm389_vm2, %v8271_v58, 0.0 }
 0x4a4   :  { %7225 = vpow2.f32 %v3032_v10  ;;  %v2976_v29 = vsub.f32 %v8125_v41, %v2938_v1  ;;  %v2977_v7 = vsub.f32 %v8127_v51, %v2941_v4  ;;  %3108 = vadd.xlane.f32.xlu0 %v3107_v32  ;;  %3105 = vadd.xlane.f32.xlu1 %v3104_v56 }
 0x4a5   :  { %7227 = vpow2.f32 %v3034_v59  ;;  %v8279_v25 = vpop.eup %7217 }
 0x4a6   :  { %v3036_v3 = vmul.f32 1.442695, %v2976_v29  ;;  %v8281_v12 = vpop.eup %7219  ;;  %v3038_v15 = vmul.f32 1.442695, %v2977_v7  ;;  %v3113_v18 = vsel %vm389_vm2, %v8279_v25, 0.0 }
 0x4a7   :  { %v2947_v57 = vpop.xlane.xlu1 %2946  ;;  %v3110_v41 = vsel %vm389_vm2, %v8281_v12, 0.0 }
 0x4a8   :  { %7229 = vpow2.f32 %v3036_v3  ;;  %v2979_v49 = vsub.f32 %v8137_v33, %v2947_v57  ;;  %3114 = vadd.xlane.f32.xlu0 %v3113_v18  ;;  %3111 = vadd.xlane.f32.xlu1 %v3110_v41 }
 0x4a9   :  { %7231 = vpow2.f32 %v3038_v15  ;;  %v8288_v51 = vpop.eup %7221 }
 0x4aa   :  { %v8290_v21 = vpop.eup %7223  ;;  %v3042_v61 = vmul.f32 1.442695, %v2979_v49  ;;  %v3119_v43 = vsel %vm389_vm2, %v8288_v51, 0.0  ;;  %v8832_v49 = vmov 0.0  }
 0x4ab   :  { %v3116_v44 = vsel %vm389_vm2, %v8290_v21, 0.0 }
 0x4ac   :  { %7233 = vpow2.f32 %v3042_v61  ;;  %3120 = vadd.xlane.f32.xlu0 %v3119_v43  ;;  %3117 = vadd.xlane.f32.xlu1 %v3116_v44  ;;  %v8329_v43 = vpop.permute.xlu1 %5408 }
 0x4ae   :  { %v8296_v38 = vpop.eup %7225 }
 0x4af   :  { %v8298_v63 = vpop.eup %7227  ;;  %v3122_v33 = vsel %vm389_vm2, %v8296_v38, 0.0 }
 0x4b0   :  { %v3125_v10 = vsel %vm389_vm2, %v8298_v63, 0.0  ;;  %3123 = vadd.xlane.f32.xlu1 %v3122_v33 }
 0x4b1   :  { %3126 = vadd.xlane.f32.xlu0 %v3125_v10 }
 0x4b2   :  { %v8304_v59 = vpop.eup %7229 }
 0x4b3   :  { %v8306_v1 = vpop.eup %7231  ;;  %v3128_v32 = vsel %vm389_vm2, %v8304_v59, 0.0 }
 0x4b4   :  { %v3131_v4 = vsel %vm389_vm2, %v8306_v1, 0.0  ;;  %3129 = vadd.xlane.f32.xlu1 %v3128_v32 }
 0x4b5   :  { %3132 = vadd.xlane.f32.xlu0 %v3131_v4 }
 0x4b6   :  { %v8312_v29 = vpop.eup %7233 }
 0x4b7   :  { %v3137_v56 = vsel %vm389_vm2, %v8312_v29, 0.0 }
 0x4b9   :  { %3138 = vadd.xlane.f32.xlu0 %v3137_v56 }
 0x4bf   :  { %v3046_v7 = vpop.xlane.xlu0 %3045 }
 0x4c0   :  { %7235 = vrcp.f32 %v3046_v7 }
 0x4c3   :  { %v2944_v3 = vpop.xlane.xlu0 %2943 }
 0x4c4   :  { %v2978_v15 = vsub.f32 %v8156_v54, %v2944_v3 }
 0x4c6   :  { %v3040_v18 = vmul.f32 1.442695, %v2978_v15 }
 0x4c7   :  { %v8339_v4 = vpop.permute.xlu0 %5332 }
 0x4c8   :  { %7237 = vpow2.f32 %v3040_v18 }
 0x4ca   :  { %v7236_v57 = vpop.eup %7235 }
 0x4cb   :  { %v3172_v41 = vmul.f32 %v7236_v57, %v8154_v35 }
 0x4cd   :  { %6847 = vmatmul.mubr.msk.f32.vlgmr.msra.gmra.mrb[36].mxu1 %vm389_vm2, %v3172_v41 }
 0x4ce   :  { %6855 = vmatpush3.msra.mxu1 %v8009_v20  ;;  %6856 = vmatprep.mubr.msk.f32.mxu1 %vm7377_vm1, %v8832_v49 }
 0x4cf   :  { %5484 = vrot.lane.b32.xlu0 %v7733_v30, %s7380_s25  ;;  %6864 = vmatprep.subr.mxu1 %v8832_v49 }
 0x4d2   :  { %v8325_v61 = vpop.eup %7237 }
 0x4d3   :  { %v3134_v54 = vsel %vm389_vm2, %v8325_v61, 0.0 }
 0x4d4   :  { %3135 = vadd.xlane.f32.xlu1 %v3134_v54 }
 0x4dc   :  { %v3049_v35 = vpop.xlane.xlu1 %3048 }
 0x4dd   :  { %7239 = vrcp.f32 %v3049_v35 }
 0x4e0   :  { %v3061_v44 = vpop.xlane.xlu1 %3060 }
 0x4e4   :  { %v3067_v20 = vpop.xlane.xlu1 %3066 }
 0x4e5   :  { %5560 = vrot.lane.b32.xlu1 %v7737_v31, %s7380_s25 }
 0x4e7   :  { %v7240_v30 = vpop.eup %7239 }
 0x4e8   :  { %v3173_v33 = vmul.f32 %v7240_v30, %v8168_v60  ;;  %v3055_v10 = vpop.xlane.xlu1 %3054 }
 0x4e9   :  { %7241 = vrcp.f32 %v3055_v10 }
 0x4ea   :  { %6852 = vmatmul.mubr.msk.f32.vlgmr.msra.gmra.mrb[36].mxu0 %vm389_vm2, %v3173_v33  ;;  %7243 = vrcp.f32 %v3061_v44 }
 0x4eb   :  { %6860 = vmatpush3.msra.mxu0 %v8013_v37  ;;  %6861 = vmatprep.mubr.msk.f32.mxu0 %vm7377_vm1, %v8832_v49  ;;  %7245 = vrcp.f32 %v3067_v20 }
 0x4ec   :  { %6869 = vmatprep.subr.mxu0 %v8832_v49 }
 0x4f3   :  { %v7242_v32 = vpop.eup %7241 }
 0x4f4   :  { %v3175_v31 = vmul.f32 %v7242_v32, %v8183_v24  ;;  %v7244_v56 = vpop.eup %7243 }
 0x4f5   :  { %v3177_v37 = vmul.f32 %v7244_v56, %v8174_v13  ;;  %v7246_v7 = vpop.eup %7245 }
 0x4f6   :  { %6862 = vmatmul.mubr.msk.f32.vlgmr.msra.gmra.mrb[38].mxu0 %vm389_vm2, %v3175_v31  ;;  %v3179_v24 = vmul.f32 %v7246_v7, %v8178_v9  ;;  %v8833_v7 = vld [vmem:[#allocation10_spill] sm:$0xff] }
 0x4f7   :  { %6870 = vmatpush3.msra.mxu0 %v8021_v28  ;;  %6871 = vmatprep.mubr.msk.f32.mxu0 %vm7377_vm1, %v8832_v49 }
 0x4f8   :  { %v3052_v60 = vpop.xlane.xlu0 %3051  ;;  %6879 = vmatprep.subr.mxu0 %v8832_v49 }
 0x4f9   :  { %7247 = vrcp.f32 %v3052_v60 }
 0x4fa   :  { %6872 = vmatmul.mubr.msk.f32.vlgmr.msra.gmra.mrb[40].mxu0 %vm389_vm2, %v3177_v37 }
 0x4fb   :  { %6880 = vmatpush3.msra.mxu0 %v8029_v52  ;;  %6881 = vmatprep.mubr.msk.f32.mxu0 %vm7377_vm1, %v8832_v49 }
 0x4fc   :  { %v3058_v28 = vpop.xlane.xlu0 %3057  ;;  %6889 = vmatprep.subr.mxu0 %v8832_v49 }
 0x4fd   :  { %7249 = vrcp.f32 %v3058_v28 }
 0x4fe   :  { %6882 = vmatmul.mubr.msk.f32.vlgmr.msra.gmra.mrb[42].mxu0 %vm389_vm2, %v3179_v24 }
 0x4ff   :  { %6890 = vmatpush3.msra.mxu0 %v8039_v39  ;;  %6891 = vmatprep.mubr.msk.f32.mxu0 %vm7377_vm1, %v8832_v49 }
 0x500   :  { %v3064_v13 = vpop.xlane.xlu0 %3063  ;;  %6899 = vmatprep.subr.mxu0 %v8832_v49 }
 0x501   :  { %7251 = vrcp.f32 %v3064_v13 }
 0x503   :  { %v7248_v52 = vpop.eup %7247 }
 0x504   :  { %v3174_v3 = vmul.f32 %v7248_v52, %v8189_v17 }
 0x506   :  { %6857 = vmatmul.mubr.msk.f32.vlgmr.msra.gmra.mrb[38].mxu1 %vm389_vm2, %v3174_v3 }
 0x507   :  { %v7250_v9 = vpop.eup %7249  ;;  %6865 = vmatpush3.msra.mxu1 %v8011_v36  ;;  %6866 = vmatprep.mubr.msk.f32.mxu1 %vm7377_vm1, %v8832_v49 }
 0x508   :  { %v3176_v39 = vmul.f32 %v7250_v9, %v8193_v6  ;;  %6874 = vmatprep.subr.mxu1 %v8832_v49 }
 0x50a   :  { %6867 = vmatmul.mubr.msk.f32.vlgmr.msra.gmra.mrb[40].mxu1 %vm389_vm2, %v3176_v39 }
 0x50b   :  { %v7252_v15 = vpop.eup %7251  ;;  %6875 = vmatpush3.msra.mxu1 %v8015_v40  ;;  %6876 = vmatprep.mubr.msk.f32.mxu1 %vm7377_vm1, %v8832_v49 }
 0x50c   :  { %v3178_v17 = vmul.f32 %v7252_v15, %v8197_v47  ;;  %6884 = vmatprep.subr.mxu1 %v8832_v49  ;;  %v8836_v15 = vld [vmem:[#allocation13_spill] sm:$0xff] }
 0x50e   :  { %6877 = vmatmul.mubr.msk.f32.vlgmr.msra.gmra.mrb[42].mxu1 %vm389_vm2, %v3178_v17 }
 0x50f   :  { %6885 = vmatpush3.msra.mxu1 %v8027_v50  ;;  %6886 = vmatprep.mubr.msk.f32.mxu1 %vm7377_vm1, %v8832_v49 }
 0x510   :  { %v3073_v36 = vpop.xlane.xlu1 %3072  ;;  %6894 = vmatprep.subr.mxu1 %v8832_v49 }
 0x511   :  { %7253 = vrcp.f32 %v3073_v36  ;;  %v3070_v6 = vpop.xlane.xlu0 %3069 }
 0x512   :  { %7255 = vrcp.f32 %v3070_v6 }
 0x518   :  { %v3079_v40 = vpop.xlane.xlu1 %3078 }
 0x519   :  { %7257 = vrcp.f32 %v3079_v40 }
 0x51b   :  { %v7254_v18 = vpop.eup %7253 }
 0x51c   :  { %v7256_v57 = vpop.eup %7255  ;;  %v3181_v47 = vmul.f32 %v7254_v18, %v8205_v5  ;;  %v3076_v41 = vpop.xlane.xlu0 %3075 }
 0x51d   :  { %v3180_v54 = vmul.f32 %v7256_v57, %v8207_v42  ;;  %7259 = vrcp.f32 %v3076_v41  ;;  %v8838_v57 = vld [vmem:[#allocation14_spill] sm:$0xff] }
 0x51e   :  { %6892 = vmatmul.mubr.msk.f32.vlgmr.msra.gmra.mrb[44].mxu0 %vm389_vm2, %v3181_v47 }
 0x51f   :  { %6900 = vmatpush3.msra.mxu0 %v8057_v14  ;;  %6887 = vmatmul.mubr.msk.f32.vlgmr.msra.gmra.mrb[44].mxu1 %vm389_vm2, %v3180_v54 }
 0x520   :  { %6895 = vmatpush3.msra.mxu1 %v8035_v55  ;;  %v3085_v50 = vpop.xlane.xlu1 %3084  ;;  %6901 = vmatprep.mubr.msk.f32.mxu0 %vm7377_vm1, %v8832_v49 }
 0x521   :  { %7261 = vrcp.f32 %v3085_v50  ;;  %v3082_v35 = vpop.xlane.xlu0 %3081  ;;  %6909 = vmatprep.subr.mxu0 %v8832_v49  ;;  %6896 = vmatprep.mubr.msk.f32.mxu1 %vm7377_vm1, %v8832_v49 }
 0x522   :  { %7263 = vrcp.f32 %v3082_v35  ;;  %6904 = vmatprep.subr.mxu1 %v8832_v49 }
 0x523   :  { %v7258_v5 = vpop.eup %7257 }
 0x524   :  { %v3183_v14 = vmul.f32 %v7258_v5, %v8217_v11  ;;  %v8840_v5 = vld [vmem:[#allocation9_spill] sm:$0xff] }
 0x525   :  { %v3088_v42 = vpop.xlane.xlu1 %3087  ;;  %v3091_v44 = vpop.xlane.xlu0 %3090 }
 0x526   :  { %7265 = vrcp.f32 %v3088_v42  ;;  %6902 = vmatmul.mubr.msk.f32.vlgmr.msra.gmra.mrb[46].mxu0 %vm389_vm2, %v3183_v14 }
 0x527   :  { %v7260_v55 = vpop.eup %7259  ;;  %7267 = vrcp.f32 %v3091_v44  ;;  %6910 = vmatpush3.msra.mxu0 %v8077_v53  ;;  %6911 = vmatprep.mubr.msk.f32.mxu0 %vm7377_vm1, %v8832_v49 }
 0x528   :  { %v3182_v20 = vmul.f32 %v7260_v55, %v8223_v8  ;;  %6919 = vmatprep.subr.mxu0 %v8832_v49 }
 0x529   :  { %v3094_v30 = vpop.xlane.xlu1 %3093  ;;  %v3097_v33 = vpop.xlane.xlu0 %3096 }
 0x52a   :  { %7269 = vrcp.f32 %v3094_v30  ;;  %6897 = vmatmul.mubr.msk.f32.vlgmr.msra.gmra.mrb[46].mxu1 %vm389_vm2, %v3182_v20 }
 0x52b   :  { %v7262_v11 = vpop.eup %7261  ;;  %7271 = vrcp.f32 %v3097_v33  ;;  %6905 = vmatpush3.msra.mxu1 %v8047_v2  ;;  %6906 = vmatprep.mubr.msk.f32.mxu1 %vm7377_vm1, %v8832_v49 }
 0x52c   :  { %v7264_v53 = vpop.eup %7263  ;;  %v3185_v10 = vmul.f32 %v7262_v11, %v8229_v22  ;;  %6914 = vmatprep.subr.mxu1 %v8832_v49  ;;  %v8843_v11 = vld [vmem:[#allocation18_spill] sm:$0xff] }
 0x52d   :  { %v3184_v8 = vmul.f32 %v7264_v53, %v8231_v0  ;;  %v3100_v32 = vpop.xlane.xlu1 %3099  ;;  %v3103_v31 = vpop.xlane.xlu0 %3102 }
 0x52e   :  { %7273 = vrcp.f32 %v3100_v32  ;;  %6912 = vmatmul.mubr.msk.f32.vlgmr.msra.gmra.mrb[48].mxu0 %vm389_vm2, %v3185_v10 }
 0x52f   :  { %7275 = vrcp.f32 %v3103_v31  ;;  %6907 = vmatmul.mubr.msk.f32.vlgmr.msra.gmra.mrb[48].mxu1 %vm389_vm2, %v3184_v8  ;;  %6920 = vmatpush3.msra.mxu0 %v8097_v19 }
 0x530   :  { %v7266_v2 = vpop.eup %7265  ;;  %6915 = vmatpush3.msra.mxu1 %v8135_v26  ;;  %6916 = vmatprep.mubr.msk.f32.mxu1 %vm7377_vm1, %v8832_v49 }
 0x531   :  { %v7268_v22 = vpop.eup %7267  ;;  %v3186_v56 = vmul.f32 %v7266_v2, %v8241_v27  ;;  %v3106_v0 = vpop.xlane.xlu1 %3105  ;;  %6921 = vmatprep.mubr.msk.f32.mxu0 %vm7377_vm1, %v8832_v49  ;;  %6924 = vmatprep.subr.mxu1 %v8832_v49 }
 0x532   :  { %v3109_v37 = vpop.xlane.xlu0 %3108  ;;  %v3187_v60 = vmul.f32 %v7268_v22, %v8239_v62  ;;  %7277 = vrcp.f32 %v3106_v0  ;;  %6929 = vmatprep.subr.mxu0 %v8832_v49 }
 0x533   :  { %7279 = vrcp.f32 %v3109_v37  ;;  %6917 = vmatmul.mubr.msk.f32.vlgmr.msra.gmra.mrb[50].mxu1 %vm389_vm2, %v3186_v56 }
 0x534   :  { %v7270_v19 = vpop.eup %7269  ;;  %6922 = vmatmul.mubr.msk.f32.vlgmr.msra.gmra.mrb[50].mxu0 %vm389_vm2, %v3187_v60  ;;  %6925 = vmatpush3.msra.mxu1 %v8067_v34 }
 0x535   :  { %v7272_v26 = vpop.eup %7271  ;;  %v3188_v27 = vmul.f32 %v7270_v19, %v8251_v23  ;;  %6930 = vmatpush3.msra.mxu0 %v8833_v7  ;;  %v3112_v24 = vpop.xlane.xlu1 %3111  ;;  %6926 = vmatprep.mubr.msk.f32.mxu1 %vm7377_vm1, %v8832_v49  ;;  %v8834_v23 = vld [vmem:[#allocation8_spill] sm:$0xff] }
 0x536   :  { %v3115_v28 = vpop.xlane.xlu0 %3114  ;;  %v3189_v62 = vmul.f32 %v7272_v26, %v8249_v45  ;;  %7281 = vrcp.f32 %v3112_v24  ;;  %6931 = vmatprep.mubr.msk.f32.mxu0 %vm7377_vm1, %v8832_v49  ;;  %6934 = vmatprep.subr.mxu1 %v8832_v49  ;;  %v8835_v45 = vld [vmem:[#allocation12_spill] sm:$0xff] }
 0x537   :  { %7283 = vrcp.f32 %v3115_v28  ;;  %6939 = vmatprep.subr.mxu0 %v8832_v49  ;;  %6927 = vmatmul.mubr.msk.f32.vlgmr.msra.gmra.mrb[52].mxu1 %vm389_vm2, %v3188_v27 }
 0x538   :  { %v7274_v34 = vpop.eup %7273  ;;  %6932 = vmatmul.mubr.msk.f32.vlgmr.msra.gmra.mrb[52].mxu0 %vm389_vm2, %v3189_v62  ;;  %6935 = vmatpush3.msra.mxu1 %v8834_v23 }
 0x539   :  { %v7276_v13 = vpop.eup %7275  ;;  %v3190_v52 = vmul.f32 %v7274_v34, %v8261_v46  ;;  %6940 = vmatpush3.msra.mxu0 %v8835_v45  ;;  %v3118_v3 = vpop.xlane.xlu1 %3117  ;;  %6936 = vmatprep.mubr.msk.f32.mxu1 %vm7377_vm1, %v8832_v49 }
 0x53a   :  { %v3121_v9 = vpop.xlane.xlu0 %3120  ;;  %v3191_v39 = vmul.f32 %v7276_v13, %v8259_v48  ;;  %7285 = vrcp.f32 %v3118_v3  ;;  %6941 = vmatprep.mubr.msk.f32.mxu0 %vm7377_vm1, %v8832_v49  ;;  %6944 = vmatprep.subr.mxu1 %v8832_v49  ;;  %v8837_v48 = vld [vmem:[#allocation15_spill] sm:$0xff] }
 0x53b   :  { %7287 = vrcp.f32 %v3121_v9  ;;  %6949 = vmatprep.subr.mxu0 %v8832_v49  ;;  %6937 = vmatmul.mubr.msk.f32.vlgmr.msra.gmra.mrb[54].mxu1 %vm389_vm2, %v3190_v52 }
 0x53c   :  { %v7278_v46 = vpop.eup %7277  ;;  %6942 = vmatmul.mubr.msk.f32.vlgmr.msra.gmra.mrb[54].mxu0 %vm389_vm2, %v3191_v39  ;;  %6945 = vmatpush3.msra.mxu1 %v8836_v15 }
 0x53d   :  { %v7280_v17 = vpop.eup %7279  ;;  %v3192_v36 = vmul.f32 %v7278_v46, %v8271_v58  ;;  %6950 = vmatpush3.msra.mxu0 %v8837_v48  ;;  %v3124_v6 = vpop.xlane.xlu1 %3123  ;;  %6946 = vmatprep.mubr.msk.f32.mxu1 %vm7377_vm1, %v8832_v49 }
 0x53e   :  { %v3127_v40 = vpop.xlane.xlu0 %3126  ;;  %v3193_v18 = vmul.f32 %v7280_v17, %v8269_v16  ;;  %7289 = vrcp.f32 %v3124_v6  ;;  %6951 = vmatprep.mubr.msk.f32.mxu0 %vm7377_vm1, %v8832_v49  ;;  %6954 = vmatprep.subr.mxu1 %v8832_v49  ;;  %v8839_v16 = vld [vmem:[#allocation16_spill] sm:$0xff] }
 0x53f   :  { %7291 = vrcp.f32 %v3127_v40  ;;  %6959 = vmatprep.subr.mxu0 %v8832_v49  ;;  %6947 = vmatmul.mubr.msk.f32.vlgmr.msra.gmra.mrb[56].mxu1 %vm389_vm2, %v3192_v36 }
 0x540   :  { %v7282_v58 = vpop.eup %7281  ;;  %6952 = vmatmul.mubr.msk.f32.vlgmr.msra.gmra.mrb[56].mxu0 %vm389_vm2, %v3193_v18  ;;  %6955 = vmatpush3.msra.mxu1 %v8838_v57  ;;  %v5758_v18 = vld [vmem:[%s8810_s4] sm:$0xff] }
 0x541   :  { %v7284_v47 = vpop.eup %7283  ;;  %v3194_v41 = vmul.f32 %v7282_v58, %v8281_v12  ;;  %6960 = vmatpush3.msra.mxu0 %v8839_v16  ;;  %v3130_v54 = vpop.xlane.xlu1 %3129  ;;  %6956 = vmatprep.mubr.msk.f32.mxu1 %vm7377_vm1, %v8832_v49  ;;  %v5759_v58 = vld [vmem:[%s8810_s4 + $0x8] sm:$0xff] }
 0x542   :  { %v3133_v50 = vpop.xlane.xlu0 %3132  ;;  %v3195_v35 = vmul.f32 %v7284_v47, %v8279_v25  ;;  %7293 = vrcp.f32 %v3130_v54  ;;  %6961 = vmatprep.mubr.msk.f32.mxu0 %vm7377_vm1, %v8832_v49  ;;  %6964 = vmatprep.subr.mxu1 %v8832_v49  ;;  %v8841_v25 = vld [vmem:[#allocation17_spill] sm:$0xff]  ;;  %v7096_v47 = vpack.c.bf16 %v5759_v58, %v5758_v18 }
 0x543   :  { %7295 = vrcp.f32 %v3133_v50  ;;  %6969 = vmatprep.subr.mxu0 %v8832_v49  ;;  %6957 = vmatmul.mubr.msk.f32.vlgmr.msra.gmra.mrb[58].mxu1 %vm389_vm2, %v3194_v41  ;;  %v5760_v50 = vld [vmem:[%s8810_s4 + $0x10] sm:$0xff] }
 0x544   :  { %v7286_v12 = vpop.eup %7285  ;;  %6962 = vmatmul.mubr.msk.f32.vlgmr.msra.gmra.mrb[58].mxu0 %vm389_vm2, %v3195_v35  ;;  %6965 = vmatpush3.msra.mxu1 %v8840_v5  ;;  %v5761_v35 = vld [vmem:[%s8810_s4 + $0x18] sm:$0xff]  ;;  %s7383_s4 = smov 24  }
 0x545   :  { %v7288_v14 = vpop.eup %7287  ;;  %v3196_v42 = vmul.f32 %v7286_v12, %v8290_v21  ;;  %6970 = vmatpush3.msra.mxu0 %v8841_v25  ;;  %6966 = vmatprep.mubr.msk.f32.mxu1 %vm7377_vm1, %v8832_v49  ;;  %v8842_v21 = vld [vmem:[#allocation11_spill] sm:$0xff]  ;;  %v7100_v5 = vpack.c.bf16 %v5761_v35, %v5760_v50 }
 0x546   :  { %v3197_v44 = vmul.f32 %v7288_v14, %v8288_v51  ;;  %6971 = vmatprep.mubr.msk.f32.mxu0 %vm7377_vm1, %v8832_v49  ;;  %6974 = vmatprep.subr.mxu1 %v8832_v49  ;;  %v3139_v33 = vpop.xlane.xlu0 %3138 }
 0x547   :  { %6979 = vmatprep.subr.mxu0 %v8832_v49  ;;  %6967 = vmatmul.mubr.msk.f32.vlgmr.msra.gmra.mrb[60].mxu1 %vm389_vm2, %v3196_v42  ;;  %7297 = vrcp.f32 %v3139_v33 }
 0x548   :  { %v7290_v55 = vpop.eup %7289  ;;  %6972 = vmatmul.mubr.msk.f32.vlgmr.msra.gmra.mrb[60].mxu0 %vm389_vm2, %v3197_v44  ;;  %6975 = vmatpush3.msra.mxu1 %v8842_v21 }
 0x549   :  { %v7292_v20 = vpop.eup %7291  ;;  %v3198_v30 = vmul.f32 %v7290_v55, %v8296_v38  ;;  %6980 = vmatpush3.msra.mxu0 %v8843_v11  ;;  %6976 = vmatprep.mubr.msk.f32.mxu1 %vm7377_vm1, %v8832_v49 }
 0x54a   :  { %v3199_v51 = vmul.f32 %v7292_v20, %v8298_v63  ;;  %6981 = vmatprep.mubr.msk.f32.mxu0 %vm7377_vm1, %v8832_v49  ;;  %6984 = vmatprep.subr.mxu1 %v8832_v49  ;;  %v5485_v8 = vpop.permute.xlu0 %5484 }
 0x54b   :  { %6989 = vmatprep.subr.mxu0 %v8832_v49  ;;  %6977 = vmatmul.mubr.msk.f32.vlgmr.msra.gmra.mrb[62].mxu1 %vm389_vm2, %v3198_v30 }
 0x54c   :  { %v7294_v53 = vpop.eup %7293  ;;  %6982 = vmatmul.mubr.msk.f32.vlgmr.msra.gmra.mrb[62].mxu0 %vm389_vm2, %v3199_v51  ;;  %6985 = vmatpush3.msra.mxu1 %v8339_v4 }
 0x54d   :  { %v7296_v38 = vpop.eup %7295  ;;  %v3200_v10 = vmul.f32 %v7294_v53, %v8304_v59  ;;  %6990 = vmatpush3.msra.mxu0 %v8329_v43  ;;  %6986 = vmatprep.mubr.msk.f32.mxu1 %vm7377_vm1, %v8832_v49 }
 0x54e   :  { %v3201_v63 = vmul.f32 %v7296_v38, %v8306_v1  ;;  %6991 = vmatprep.mubr.msk.f32.mxu0 %vm7377_vm1, %v8832_v49  ;;  %6994 = vmatprep.subr.mxu1 %v8832_v49 }
 0x54f   :  { %6987 = vmatmul.mubr.msk.f32.vlgmr.msra.gmra.mrb[64].mxu1 %vm389_vm2, %v3200_v10  ;;  %6999 = vmatprep.subr.mxu0 %v8832_v49 }
 0x550   :  { %6992 = vmatmul.mubr.msk.f32.vlgmr.msra.gmra.mrb[64].mxu0 %vm389_vm2, %v3201_v63  ;;  %6995 = vmatpush3.msra.mxu1 %v5485_v8 }
 0x551   :  { %7001 = vmatprep.mubr.msk.f32.mxu0 %vm7377_vm1, %v8832_v49  ;;  %6996 = vmatprep.mubr.msk.f32.mxu1 %vm7377_vm1, %v8832_v49  ;;  %v7298_v1 = vpop.eup %7297 }
 0x552   :  { %v3203_v43 = vmul.f32 %v7298_v1, %v8312_v29 }
 0x561   :  { %v3136_v59 = vpop.xlane.xlu1 %3135 }
 0x562   :  { %7299 = vrcp.f32 %v3136_v59 }
 0x565   :  { %v5561_v4 = vpop.permute.xlu1 %5560 }
 0x566   :  { %7000 = vmatpush3.msra.mxu0 %v5561_v4 }
 0x567   :  { %7002 = vmatmul.mubr.msk.f32.vlgmr.msra.gmra.mrb[66].mxu0 %vm389_vm2, %v3203_v43  ;;  %7097 = vmatprep.subr.bf16.mxu0 %v7096_v47 }
 0x568   :  { %7099 = vmatpush3.bf16.msra.mxu0 %v7096_v47 }
 0x569   :  { %7101 = vmatprep.subr.bf16.mxu0 %v7100_v5 }
 0x56c   :  { %v7300_v32 = vpop.eup %7299  ;;  %7103 = vmatpush3.bf16.msra.mxu0 %v7100_v5 }
 0x56d   :  { %v3202_v31 = vmul.f32 %v7300_v32, %v8325_v61 }
 0x56f   :  { %6997 = vmatmul.mubr.msk.f32.vlgmr.msra.gmra.mrb[66].mxu1 %vm389_vm2, %v3202_v31 }
 0x5a0   :  { %v8509_v2 = vpop.f32.mrb[36].mxu1 }
 0x5a1   :  { %v6848_v22 = vpop.f32.mrb[37].mxu1 }
 0x5bd   :  { %v8511_v56 = vpop.f32.mrb[36].mxu0 }
 0x5be   :  { %v6853_v49 = vpop.f32.mrb[37].mxu0 }
 0x5c9   :  { %v8513_v0 = vpop.f32.mrb[38].mxu0 }
 0x5ca   :  { %v6863_v37 = vpop.f32.mrb[39].mxu0 }
 0x5cd   :  { %v8515_v60 = vpop.f32.mrb[40].mxu0 }
 0x5ce   :  { %v6873_v29 = vpop.f32.mrb[41].mxu0 }
 0x5d1   :  { %v8517_v19 = vpop.f32.mrb[42].mxu0 }
 0x5d2   :  { %v6883_v26 = vpop.f32.mrb[43].mxu0 }
 0x5d9   :  { %v8519_v27 = vpop.f32.mrb[38].mxu1 }
 0x5da   :  { %v6858_v61 = vpop.f32.mrb[39].mxu1 }
 0x5dd   :  { %v8521_v7 = vpop.f32.mrb[40].mxu1 }
 0x5de   :  { %v6868_v24 = vpop.f32.mrb[41].mxu1 }
 0x5e1   :  { %v8523_v28 = vpop.f32.mrb[42].mxu1 }
 0x5e2   :  { %v6878_v62 = vpop.f32.mrb[43].mxu1 }
 0x5f1   :  { %v3960_v34 = vpop.f32.mrb[44].mxu0 }
 0x5f2   :  { %v6893_v23 = vpop.f32.mrb[45].mxu0  ;;  %5646 = vrot.lane.b32.xlu1 %v3960_v34, %s7381_s26  ;;  %v3884_v13 = vpop.f32.mrb[44].mxu1 }
 0x5f3   :  { %5644 = vrot.lane.b32.xlu0 %v3884_v13, %s7381_s26  ;;  %v6888_v52 = vpop.f32.mrb[45].mxu1 }
 0x5f9   :  { %v4112_v45 = vpop.f32.mrb[46].mxu0 }
 0x5fa   :  { %v6903_v3 = vpop.f32.mrb[47].mxu0  ;;  %5650 = vrot.lane.b32.xlu1 %v4112_v45, %s7381_s26 }
 0x5fd   :  { %v4036_v9 = vpop.f32.mrb[46].mxu1 }
 0x5fe   :  { %5648 = vrot.lane.b32.xlu0 %v4036_v9, %s7381_s26  ;;  %v6898_v39 = vpop.f32.mrb[47].mxu1 }
 0x601   :  { %v4264_v46 = vpop.f32.mrb[48].mxu0 }
 0x602   :  { %v4188_v15 = vpop.f32.mrb[48].mxu1  ;;  %v6913_v17 = vpop.f32.mrb[49].mxu0  ;;  %5654 = vrot.lane.b32.xlu1 %v4264_v46, %s7381_s26 }
 0x603   :  { %5652 = vrot.lane.b32.xlu0 %v4188_v15, %s7381_s26  ;;  %v6908_v36 = vpop.f32.mrb[49].mxu1 }
 0x606   :  { %v4340_v48 = vpop.f32.mrb[50].mxu1 }
 0x607   :  { %v4416_v6 = vpop.f32.mrb[50].mxu0  ;;  %5656 = vrot.lane.b32.xlu0 %v4340_v48, %s7381_s26  ;;  %v6918_v40 = vpop.f32.mrb[51].mxu1 }
 0x608   :  { %5658 = vrot.lane.b32.xlu1 %v4416_v6, %s7381_s26  ;;  %v6923_v57 = vpop.f32.mrb[51].mxu0 }
 0x60a   :  { %v4492_v41 = vpop.f32.mrb[52].mxu1 }
 0x60b   :  { %v4568_v16 = vpop.f32.mrb[52].mxu0  ;;  %5676 = vrot.lane.b32.xlu0 %v4492_v41, %s7382_s13  ;;  %v6928_v54 = vpop.f32.mrb[53].mxu1 }
 0x60c   :  { %5678 = vrot.lane.b32.xlu1 %v4568_v16, %s7382_s13  ;;  %v6933_v12 = vpop.f32.mrb[53].mxu0 }
 0x60e   :  { %v4644_v14 = vpop.f32.mrb[54].mxu1 }
 0x60f   :  { %v4720_v42 = vpop.f32.mrb[54].mxu0  ;;  %5680 = vrot.lane.b32.xlu0 %v4644_v14, %s7382_s13  ;;  %v6938_v25 = vpop.f32.mrb[55].mxu1 }
 0x610   :  { %5682 = vrot.lane.b32.xlu1 %v4720_v42, %s7382_s13  ;;  %v6943_v44 = vpop.f32.mrb[55].mxu0 }
 0x612   :  { %v4796_v55 = vpop.f32.mrb[56].mxu1 }
 0x613   :  { %v4872_v21 = vpop.f32.mrb[56].mxu0  ;;  %5684 = vrot.lane.b32.xlu0 %v4796_v55, %s7382_s13  ;;  %v6948_v20 = vpop.f32.mrb[57].mxu1 }
 0x614   :  { %5686 = vrot.lane.b32.xlu1 %v4872_v21, %s7382_s13  ;;  %v6953_v30 = vpop.f32.mrb[57].mxu0 }
 0x616   :  { %v4948_v33 = vpop.f32.mrb[58].mxu1 }
 0x617   :  { %v5024_v11 = vpop.f32.mrb[58].mxu0  ;;  %5688 = vrot.lane.b32.xlu0 %v4948_v33, %s7382_s13  ;;  %v6958_v51 = vpop.f32.mrb[59].mxu1 }
 0x618   :  { %5690 = vrot.lane.b32.xlu1 %v5024_v11, %s7382_s13  ;;  %v6963_v53 = vpop.f32.mrb[59].mxu0 }
 0x61a   :  { %v5100_v38 = vpop.f32.mrb[60].mxu1 }
 0x61b   :  { %v5176_v10 = vpop.f32.mrb[60].mxu0  ;;  %5708 = vrot.lane.b32.xlu0 %v5100_v38, %s7383_s4  ;;  %v6968_v63 = vpop.f32.mrb[61].mxu1 }
 0x61c   :  { %5710 = vrot.lane.b32.xlu1 %v5176_v10, %s7383_s4  ;;  %v6973_v8 = vpop.f32.mrb[61].mxu0 }
 0x61e   :  { %v5252_v59 = vpop.f32.mrb[62].mxu1 }
 0x61f   :  { %v5328_v1 = vpop.f32.mrb[62].mxu0  ;;  %5712 = vrot.lane.b32.xlu0 %v5252_v59, %s7383_s4  ;;  %v6978_v43 = vpop.f32.mrb[63].mxu1 }
 0x620   :  { %5714 = vrot.lane.b32.xlu1 %v5328_v1, %s7383_s4  ;;  %v6983_v4 = vpop.f32.mrb[63].mxu0  ;;  %v7317_v1 = vld [vmem:[%s8806_s0 + $0x8] sm:$0xff] }
 0x621   :  { %v7318_v4 = vld [vmem:[%s8806_s0] sm:$0xff] }
 0x622   :  { %v5404_v32 = vpop.f32.mrb[64].mxu1 }
 0x623   :  { %v5480_v31 = vpop.f32.mrb[64].mxu0  ;;  %5716 = vrot.lane.b32.xlu0 %v5404_v32, %s7383_s4  ;;  %v6988_v22 = vpop.f32.mrb[65].mxu1 }
 0x624   :  { %5718 = vrot.lane.b32.xlu1 %v5480_v31, %s7383_s4  ;;  %v6993_v49 = vpop.f32.mrb[65].mxu0 }
 0x63a   :  { %v5632_v37 = vpop.f32.mrb[66].mxu0 }
 0x63b   :  { %5722 = vrot.lane.b32.xlu1 %v5632_v37, %s7383_s4  ;;  %v7003_v29 = vpop.f32.mrb[67].mxu0 }
 0x642   :  { %v5556_v26 = vpop.f32.mrb[66].mxu1 }
 0x643   :  { %5720 = vrot.lane.b32.xlu0 %v5556_v26, %s7383_s4  ;;  %v6998_v61 = vpop.f32.mrb[67].mxu1 }
 0x644   :  { %v7319_v61 = vld [vmem:[%s8806_s0 + $0x18] sm:$0xff] }
 0x664   :  { %v5647_v24 = vpop.permute.xlu1 %5646 }
 0x665   :  { %v5645_v62 = vpop.permute.xlu0 %5644  ;;  %v5733_v18 = vsel %vm389_vm2, %v8511_v56, %v5647_v24 }
 0x666   :  { %v5732_v40 = vsel %vm389_vm2, %v8509_v2, %v5645_v62 }
 0x66c   :  { %v5651_v34 = vpop.permute.xlu1 %5650 }
 0x66d   :  { %v5735_v2 = vsel %vm389_vm2, %v8513_v0, %v5651_v34 }
 0x670   :  { %v5649_v23 = vpop.permute.xlu0 %5648 }
 0x671   :  { %v5734_v50 = vsel %vm389_vm2, %v8519_v27, %v5649_v23 }
 0x674   :  { %v5655_v13 = vpop.permute.xlu1 %5654 }
 0x675   :  { %v5653_v52 = vpop.permute.xlu0 %5652  ;;  %v5737_v0 = vsel %vm389_vm2, %v8515_v60, %v5655_v13 }
 0x676   :  { %v5736_v27 = vsel %vm389_vm2, %v8521_v7, %v5653_v52  ;;  %v7320_v52 = vld [vmem:[%s8806_s0 + $0x10] sm:$0xff] }
 0x679   :  { %v5657_v45 = vpop.permute.xlu0 %5656 }
 0x67a   :  { %v5659_v3 = vpop.permute.xlu1 %5658  ;;  %v5738_v7 = vsel %vm389_vm2, %v8523_v28, %v5657_v45  ;;  %v6455_v28 = vld [vmem:[%s8811_s5] ss:$0 sm:$0xff] }
 0x67b   :  { %v5739_v60 = vsel %vm389_vm2, %v8517_v19, %v5659_v3 }
 0x67d   :  { %v5677_v9 = vpop.permute.xlu0 %5676 }
 0x67e   :  { %v5679_v39 = vpop.permute.xlu1 %5678  ;;  %v5741_v58 = vsel %vm5740_vm3, %v5732_v40, %v5677_v9  ;;  %v7321_v9 = vld [vmem:[%s8806_s0 + $0x28] sm:$0xff] }
 0x67f   :  { %v5742_v47 = vsel %vm5740_vm3, %v5733_v18, %v5679_v39 }
 0x681   :  { %v5681_v46 = vpop.permute.xlu0 %5680 }
 0x682   :  { %v5683_v15 = vpop.permute.xlu1 %5682  ;;  %v5743_v56 = vsel %vm5740_vm3, %v5734_v50, %v5681_v46 }
 0x683   :  { %v5744_v12 = vsel %vm5740_vm3, %v5735_v2, %v5683_v15  ;;  %v7322_v15 = vld [vmem:[%s8806_s0 + $0x20] sm:$0xff] }
 0x685   :  { %v5685_v17 = vpop.permute.xlu0 %5684 }
 0x686   :  { %v5687_v36 = vpop.permute.xlu1 %5686  ;;  %v5745_v25 = vsel %vm5740_vm3, %v5736_v27, %v5685_v17 }
 0x687   :  { %v5746_v55 = vsel %vm5740_vm3, %v5737_v0, %v5687_v36 }
 0x689   :  { %v5689_v48 = vpop.permute.xlu0 %5688 }
 0x68a   :  { %v5691_v6 = vpop.permute.xlu1 %5690  ;;  %v5747_v11 = vsel %vm5740_vm3, %v5738_v7, %v5689_v48 }
 0x68b   :  { %v5748_v53 = vsel %vm5740_vm3, %v5739_v60, %v5691_v6 }
 0x68d   :  { %v5709_v57 = vpop.permute.xlu0 %5708 }
 0x68e   :  { %v5711_v41 = vpop.permute.xlu1 %5710  ;;  %v5750_v16 = vsel %vm5749_vm4, %v5741_v58, %v5709_v57  ;;  %v7323_v57 = vld [vmem:[%s8806_s0 + $0x38] sm:$0xff] }
 0x68f   :  { %v5751_v54 = vsel %vm5749_vm4, %v5742_v47, %v5711_v41  ;;  %7012 = vmatprep.mubr.msk.f32.mxu0 %vm64_vm0, %v5750_v16  ;;  %v7324_v41 = vld [vmem:[%s8806_s0 + $0x30] sm:$0xff] }
 0x690   :  { %7013 = vmatmul.mubr.msk.f32.vlgmr.msra.gmra.mrb[68].mxu0 %vm64_vm0, %v5751_v54 }
 0x691   :  { %v5713_v35 = vpop.permute.xlu0 %5712 }
 0x692   :  { %v5715_v5 = vpop.permute.xlu1 %5714  ;;  %v5752_v14 = vsel %vm5749_vm4, %v5743_v56, %v5713_v35 }
 0x693   :  { %v5753_v42 = vsel %vm5749_vm4, %v5744_v12, %v5715_v5  ;;  %7015 = vmatprep.mubr.msk.f32.mxu0 %vm64_vm0, %v5752_v14 }
 0x694   :  { %7016 = vmatmul.mubr.msk.f32.gmra.mrb[70].mxu0 %vm64_vm0, %v5753_v42 }
 0x695   :  { %v5717_v44 = vpop.permute.xlu0 %5716 }
 0x696   :  { %v5719_v21 = vpop.permute.xlu1 %5718  ;;  %v5754_v20 = vsel %vm5749_vm4, %v5745_v25, %v5717_v44 }
 0x697   :  { %v5755_v30 = vsel %vm5749_vm4, %v5746_v55, %v5719_v21  ;;  %7018 = vmatprep.mubr.msk.f32.mxu0 %vm64_vm0, %v5754_v20 }
 0x698   :  { %7019 = vmatmul.mubr.msk.f32.gmra.mrb[72].mxu0 %vm64_vm0, %v5755_v30 }
 0x6ad   :  { %v5723_v33 = vpop.permute.xlu1 %5722 }
 0x6ae   :  { %v5757_v10 = vsel %vm5749_vm4, %v5748_v53, %v5723_v33 }
 0x6b5   :  { %v5721_v51 = vpop.permute.xlu0 %5720 }
 0x6b6   :  { %v5756_v38 = vsel %vm5749_vm4, %v5747_v11, %v5721_v51 }
 0x6b7   :  { %7021 = vmatprep.mubr.msk.f32.mxu0 %vm64_vm0, %v5756_v38 }
 0x6b8   :  { %7022 = vmatmul.mubr.msk.f32.gmra.mrb[74].mxu0 %vm64_vm0, %v5757_v10 }
 0x763   :  { %v7014_v63 = vpop.f32.mrb[68].mxu0 }
 0x764   :  { %v5865_v8 = vadd.f32 %v7014_v63, %v6455_v28  ;;  %v5859_v19 = vpop.f32.mrb[69].mxu0 }
 0x765   :  { %v5860_v59 = vadd.f32 %v6455_v28, %v5859_v19 }
 0x766   :  { %v8591_v43 = vadd.f32 %v7317_v1, %v5865_v8 }
 0x767   :  { %v8596_v32 = vadd.f32 %v7318_v4, %v5860_v59  ;;  %v7017_v31 = vpop.f32.mrb[70].mxu0 }
 0x768   :  { %v5875_v22 = vadd.f32 %v7017_v31, %v6455_v28  ;;  %v5869_v49 = vpop.f32.mrb[71].mxu0  ;;  %v5911_v37 = vsel %vm64_vm0, %v8591_v43, 0.0  ;;  %v6040_v31 = vld [vmem:[%s8814_s8] sm:$0xff] }
 0x769   :  { %v5870_v29 = vadd.f32 %v6455_v28, %v5869_v49  ;;  %5912 = vadd.xlane.f32.xlu1 %v5911_v37  ;;  %v5908_v26 = vsel %vm64_vm0, %v8596_v32, 0.0 }
 0x76a   :  { %v8605_v24 = vadd.f32 %v7319_v61, %v5875_v22  ;;  %5909 = vadd.xlane.f32.xlu0 %v5908_v26  ;;  %v6041_v22 = vld [vmem:[%s8814_s8 + $0x8] sm:$0xff]  ;;  %v6043_v26 = vld [vmem:[%s8814_s8 + $0x18] sm:$0xff] }
 0x76b   :  { %v7020_v62 = vpop.f32.mrb[72].mxu0  ;;  %v8612_v45 = vadd.f32 %v7320_v52, %v5870_v29  ;;  %v7104_v49 = vpack.c.bf16 %v6041_v22, %v6040_v31  ;;  %v6042_v29 = vld [vmem:[%s8814_s8 + $0x10] sm:$0xff] }
 0x76c   :  { %v5885_v34 = vadd.f32 %v7020_v62, %v6455_v28  ;;  %v5879_v23 = vpop.f32.mrb[73].mxu0  ;;  %v5917_v13 = vsel %vm64_vm0, %v8605_v24, 0.0 }
 0x76d   :  { %v5880_v3 = vadd.f32 %v6455_v28, %v5879_v23  ;;  %v5914_v36 = vsel %vm64_vm0, %v8612_v45, 0.0  ;;  %7105 = vmatprep.subr.bf16.mxu0 %v7104_v49 }
 0x76e   :  { %v8617_v39 = vadd.f32 %v7321_v9, %v5885_v34  ;;  %5918 = vadd.xlane.f32.xlu0 %v5917_v13  ;;  %7107 = vmatpush3.bf16.msra.mxu0 %v7104_v49  ;;  %v7108_v34 = vpack.c.bf16 %v6043_v26, %v6042_v29  ;;  %v6464_v26 = vld [vmem:[%s8812_s6] ss:$0 sm:$0xff] }
 0x76f   :  { %v8624_v17 = vadd.f32 %v7322_v15, %v5880_v3 }
 0x770   :  { %v5923_v46 = vsel %vm64_vm0, %v8617_v39, 0.0  ;;  %7109 = vmatprep.subr.bf16.mxu0 %v7108_v34 }
 0x771   :  { %5924 = vadd.xlane.f32.xlu1 %v5923_v46  ;;  %v5920_v48 = vsel %vm64_vm0, %v8624_v17, 0.0 }
 0x772   :  { %5915 = vadd.xlane.f32.xlu0 %v5914_v36  ;;  %7111 = vmatpush3.bf16.msra.mxu0 %v7108_v34  ;;  %v6188_v36 = vld [vmem:[%s8816_s10] sm:$0xff] }
 0x776   :  { %5921 = vadd.xlane.f32.xlu0 %v5920_v48  ;;  %v6189_v48 = vld [vmem:[%s8816_s10 + $0x8] sm:$0xff] }
 0x78b   :  { %v7023_v6 = vpop.f32.mrb[74].mxu0 }
 0x78c   :  { %v5895_v40 = vadd.f32 %v7023_v6, %v6455_v28  ;;  %v5889_v18 = vpop.f32.mrb[75].mxu0  ;;  %v6190_v6 = vld [vmem:[%s8816_s10 + $0x10] sm:$0xff] }
 0x78d   :  { %v5890_v58 = vadd.f32 %v6455_v28, %v5889_v18  ;;  %v6191_v18 = vld [vmem:[%s8816_s10 + $0x18] sm:$0xff] }
 0x78e   :  { %v8633_v47 = vadd.f32 %v7323_v57, %v5895_v40  ;;  %v7112_v40 = vpack.c.bf16 %v6189_v48, %v6188_v36  ;;  %v6192_v57 = vld [vmem:[%s8816_s10 + $0x20] sm:$0xff] }
 0x78f   :  { %v8638_v16 = vadd.f32 %v7324_v41, %v5890_v58  ;;  %v7116_v58 = vpack.c.bf16 %v6191_v18, %v6190_v6  ;;  %v6193_v41 = vld [vmem:[%s8816_s10 + $0x28] sm:$0xff] }
 0x790   :  { %v5929_v54 = vsel %vm64_vm0, %v8633_v47, 0.0  ;;  %7113 = vmatprep.subr.bf16.mxu1 %v7112_v40 }
 0x791   :  { %5930 = vadd.xlane.f32.xlu1 %v5929_v54  ;;  %v5926_v50 = vsel %vm64_vm0, %v8638_v16, 0.0  ;;  %7115 = vmatpush3.bf16.msra.mxu1 %v7112_v40  ;;  %v7120_v54 = vpack.c.bf16 %v6193_v41, %v6192_v57 }
 0x792   :  { %5927 = vadd.xlane.f32.xlu0 %v5926_v50  ;;  %7117 = vmatprep.subr.bf16.mxu1 %v7116_v58  ;;  %v6194_v50 = vld [vmem:[%s8816_s10 + $0x30] sm:$0xff] }
 0x795   :  { %7119 = vmatpush3.bf16.msra.mxu1 %v7116_v58 }
 0x796   :  { %7121 = vmatprep.subr.bf16.mxu1 %v7120_v54 }
 0x799   :  { %7123 = vmatpush3.bf16.msra.mxu1 %v7120_v54 }
 0x7f6   :  { %v5913_v2 = vpop.xlane.xlu1 %5912 }
 0x7f7   :  { %v5933_v56 = vmul.f32 0.03125, %v5913_v2  ;;  %v5910_v35 = vpop.xlane.xlu0 %5909  ;;  %v6195_v2 = vld [vmem:[%s8816_s10 + $0x38] sm:$0xff] }
 0x7f8   :  { %v5932_v12 = vmul.f32 0.03125, %v5910_v35  ;;  %v6196_v35 = vld [vmem:[%s8816_s10 + $0x40] sm:$0xff] }
 0x7f9   :  { %v8645_v5 = vsub.f32 %v8591_v43, %v5933_v56  ;;  %v7124_v56 = vpack.c.bf16 %v6195_v2, %v6194_v50 }
 0x7fa   :  { %v8648_v14 = vsub.f32 %v8596_v32, %v5932_v12  ;;  %v6197_v12 = vld [vmem:[%s8816_s10 + $0x48] sm:$0xff] }
 0x7fb   :  { %v5919_v42 = vpop.xlane.xlu0 %5918  ;;  %v5949_v27 = vmul.f32 %v8645_v5, %v8645_v5  ;;  %7125 = vmatprep.subr.bf16.mxu1 %v7124_v56 }
 0x7fc   :  { %v5935_v0 = vmul.f32 0.03125, %v5919_v42  ;;  %v5948_v25 = vmul.f32 %v8648_v14, %v8648_v14  ;;  %v7128_v42 = vpack.c.bf16 %v6197_v12, %v6196_v35  ;;  %7127 = vmatpush3.bf16.msra.mxu1 %v7124_v56 }
 0x7fd   :  { %v5959_v44 = vsel %vm64_vm0, %v5949_v27, 0.0  ;;  %v6198_v27 = vld [vmem:[%s8816_s10 + $0x50] sm:$0xff] }
 0x7fe   :  { %v8656_v55 = vsub.f32 %v8605_v24, %v5935_v0  ;;  %v5925_v21 = vpop.xlane.xlu1 %5924  ;;  %5960 = vadd.xlane.f32.xlu1 %v5959_v44  ;;  %v5956_v20 = vsel %vm64_vm0, %v5948_v25, 0.0  ;;  %v6199_v0 = vld [vmem:[%s8816_s10 + $0x58] sm:$0xff]  ;;  %7129 = vmatprep.subr.bf16.mxu1 %v7128_v42  ;;  %v6200_v44 = vld [vmem:[%s8816_s10 + $0x60] sm:$0xff] }
 0x7ff   :  { %v5937_v30 = vmul.f32 0.03125, %v5925_v21  ;;  %5957 = vadd.xlane.f32.xlu0 %v5956_v20  ;;  %v5916_v7 = vpop.xlane.xlu0 %5915  ;;  %v7132_v25 = vpack.c.bf16 %v6199_v0, %v6198_v27  ;;  %v6201_v21 = vld [vmem:[%s8816_s10 + $0x68] sm:$0xff] }
 0x800   :  { %v5934_v33 = vmul.f32 0.03125, %v5916_v7  ;;  %v5951_v60 = vmul.f32 %v8656_v55, %v8656_v55  ;;  %7131 = vmatpush3.bf16.msra.mxu1 %v7128_v42  ;;  %v7136_v20 = vpack.c.bf16 %v6201_v21, %v6200_v44 }
 0x801   :  { %v8662_v11 = vsub.f32 %v8617_v39, %v5937_v30  ;;  %7133 = vmatprep.subr.bf16.mxu1 %v7132_v25 }
 0x802   :  { %v8665_v51 = vsub.f32 %v8612_v45, %v5934_v33  ;;  %v5965_v53 = vsel %vm64_vm0, %v5951_v60, 0.0 }
 0x803   :  { %5966 = vadd.xlane.f32.xlu1 %v5965_v53  ;;  %v5922_v38 = vpop.xlane.xlu0 %5921  ;;  %v5953_v10 = vmul.f32 %v8662_v11, %v8662_v11 }
 0x804   :  { %v5936_v28 = vmul.f32 0.03125, %v5922_v38  ;;  %v5950_v63 = vmul.f32 %v8665_v51, %v8665_v51  ;;  %7135 = vmatpush3.bf16.msra.mxu1 %v7132_v25 }
 0x805   :  { %v5971_v8 = vsel %vm64_vm0, %v5953_v10, 0.0  ;;  %7137 = vmatprep.subr.bf16.mxu1 %v7136_v20 }
 0x806   :  { %v8674_v19 = vsub.f32 %v8624_v17, %v5936_v28  ;;  %v5962_v59 = vsel %vm64_vm0, %v5950_v63, 0.0 }
 0x807   :  { %5972 = vadd.xlane.f32.xlu1 %v5971_v8  ;;  %5963 = vadd.xlane.f32.xlu0 %v5962_v59 }
 0x808   :  { %v5952_v1 = vmul.f32 %v8674_v19, %v8674_v19  ;;  %7139 = vmatpush3.bf16.msra.mxu1 %v7136_v20 }
 0x80a   :  { %v5968_v4 = vsel %vm64_vm0, %v5952_v1, 0.0 }
 0x80b   :  { %5969 = vadd.xlane.f32.xlu0 %v5968_v4 }
 0x81e   :  { %v5931_v37 = vpop.xlane.xlu1 %5930 }
 0x81f   :  { %v5939_v61 = vmul.f32 0.03125, %v5931_v37  ;;  %v5928_v62 = vpop.xlane.xlu0 %5927 }
 0x820   :  { %v5938_v23 = vmul.f32 0.03125, %v5928_v62 }
 0x821   :  { %v8693_v13 = vsub.f32 %v8633_v47, %v5939_v61 }
 0x822   :  { %v8696_v52 = vsub.f32 %v8638_v16, %v5938_v23 }
 0x823   :  { %v5955_v3 = vmul.f32 %v8693_v13, %v8693_v13 }
 0x824   :  { %v5954_v9 = vmul.f32 %v8696_v52, %v8696_v52 }
 0x825   :  { %v5977_v46 = vsel %vm64_vm0, %v5955_v3, 0.0  ;;  %v6465_v3 = vld [vmem:[%s8813_s7] ss:$0 sm:$0xff] }
 0x826   :  { %5978 = vadd.xlane.f32.xlu1 %v5977_v46  ;;  %v5974_v15 = vsel %vm64_vm0, %v5954_v9, 0.0 }
 0x827   :  { %5975 = vadd.xlane.f32.xlu0 %v5974_v15 }
 0x88b   :  { %v5961_v30 = vpop.xlane.xlu1 %5960 }
 0x88c   :  { %v5981_v7 = vmul.f32 0.03125, %v5961_v30  ;;  %v5958_v33 = vpop.xlane.xlu0 %5957 }
 0x88d   :  { %v5980_v60 = vmul.f32 0.03125, %v5958_v33 }
 0x88e   :  { %v5989_v53 = vadd.f32 1e-05, %v5981_v7 }
 0x88f   :  { %v5988_v38 = vadd.f32 1e-05, %v5980_v60 }
 0x890   :  { %7301 = vrsqrt.f32 %v5989_v53  ;;  %v5967_v10 = vpop.xlane.xlu1 %5966  ;;  %v6202_v53 = vld [vmem:[%s8816_s10 + $0x70] sm:$0xff] }
 0x891   :  { %7303 = vrsqrt.f32 %v5988_v38  ;;  %v5983_v28 = vmul.f32 0.03125, %v5967_v10  ;;  %v6203_v38 = vld [vmem:[%s8816_s10 + $0x78] sm:$0xff] }
 0x892   :  { %v7140_v10 = vpack.c.bf16 %v6203_v38, %v6202_v53 }
 0x893   :  { %v5991_v63 = vadd.f32 1e-05, %v5983_v28 }
 0x894   :  { %v5973_v8 = vpop.xlane.xlu1 %5972  ;;  %v5964_v59 = vpop.xlane.xlu0 %5963  ;;  %7141 = vmatprep.subr.bf16.mxu1 %v7140_v10 }
 0x895   :  { %7305 = vrsqrt.f32 %v5991_v63  ;;  %v5985_v1 = vmul.f32 0.03125, %v5973_v8  ;;  %v5982_v4 = vmul.f32 0.03125, %v5964_v59  ;;  %7143 = vmatpush3.bf16.msra.mxu1 %v7140_v10 }
 0x897   :  { %v5993_v31 = vadd.f32 1e-05, %v5985_v1  ;;  %v5990_v22 = vadd.f32 1e-05, %v5982_v4 }
 0x898   :  { %v5970_v49 = vpop.xlane.xlu0 %5969 }
 0x899   :  { %7307 = vrsqrt.f32 %v5993_v31  ;;  %v5984_v37 = vmul.f32 0.03125, %v5970_v49 }
 0x89a   :  { %v7302_v29 = vpop.eup %7301  ;;  %7309 = vrsqrt.f32 %v5990_v22 }
 0x89b   :  { %v7304_v61 = vpop.eup %7303  ;;  %v6005_v62 = vmul.f32 %v7302_v29, %v8645_v5  ;;  %v5992_v34 = vadd.f32 1e-05, %v5984_v37 }
 0x89c   :  { %v6004_v23 = vmul.f32 %v7304_v61, %v8648_v14 }
 0x89d   :  { %v6019_v9 = vmul.f32 %v6464_v26, %v6005_v62  ;;  %7311 = vrsqrt.f32 %v5992_v34 }
 0x89e   :  { %v6018_v46 = vmul.f32 %v6464_v26, %v6004_v23 }
 0x89f   :  { %v7306_v15 = vpop.eup %7305  ;;  %v6033_v48 = vadd.f32 %v6465_v3, %v6019_v9 }
 0x8a0   :  { %v6032_v36 = vadd.f32 %v6465_v3, %v6018_v46  ;;  %v6007_v6 = vmul.f32 %v7306_v15, %v8656_v55 }
 0x8a2   :  { %7032 = vmatprep.mubr.msk.f32.mxu0 %vm64_vm0, %v6032_v36  ;;  %v6021_v18 = vmul.f32 %v6464_v26, %v6007_v6 }
 0x8a3   :  { %v7308_v40 = vpop.eup %7307  ;;  %7033 = vmatmul.mubr.msk.f32.vlgmr.msra.gmra.mrb[76].mxu0 %vm64_vm0, %v6033_v48 }
 0x8a4   :  { %v7310_v5 = vpop.eup %7309  ;;  %v6009_v58 = vmul.f32 %v7308_v40, %v8662_v11  ;;  %v6035_v2 = vadd.f32 %v6465_v3, %v6021_v18  ;;  %v6475_v40 = vld [vmem:[%s8817_s11] ss:$0 sm:$0xff]  ;;  %s7384_s11 = smov [#allocation5]  }
 0x8a5   :  { %v6006_v14 = vmul.f32 %v7310_v5, %v8665_v51  ;;  %s6337_s24 = sshll.u32 %s7384_s11, 4  ;;  %s6338_s24 = int_to_ptr.vmem [resolvable:$true] %s6337_s24 }
 0x8a6   :  { %v6023_v35 = vmul.f32 %v6464_v26, %v6009_v58  ;;  %s7347_s25 = scalar_lea.vmem %s6338_s24, 1024  ;;  %p7352_p9 = scmp.lt.s32.totalorder %s6338_s24, %s6338_s24 }
 0x8a7   :  { %v7312_v57 = vpop.eup %7311  ;;  %v6020_v41 = vmul.f32 %v6464_v26, %v6006_v14  ;;  %p7348_p8 = scmp.ne.s32.totalorder %s6338_s24, %s7347_s25  ;;  %p7353_p10 = scmp.lt.s32.totalorder %s7347_s25, %s7347_s25 }
 0x8a8   :  { %v6008_v54 = vmul.f32 %v7312_v57, %v8674_v19  ;;  %v6037_v12 = vadd.f32 %v6465_v3, %v6023_v35 }
 0x8a9   :  { %v6034_v50 = vadd.f32 %v6465_v3, %v6020_v41  ;;  %p7354_p11 = por %p7353_p10, %p7352_p9 }
 0x8aa   :  { %v6022_v56 = vmul.f32 %v6464_v26, %v6008_v54 }
 0x8ab   :  { %7035 = vmatprep.mubr.msk.f32.mxu0 %vm64_vm0, %v6034_v50  ;;  %p7355_p12 = pnand %p7354_p11, %p7348_p8 }
 0x8ac   :  { %7036 = vmatmul.mubr.msk.f32.gmra.mrb[78].mxu0 %vm64_vm0, %v6035_v2  ;;  %v6036_v55 = vadd.f32 %v6465_v3, %v6022_v56 }
 0x8ae   :  { %7038 = vmatprep.mubr.msk.f32.mxu0 %vm64_vm0, %v6036_v55 }
 0x8b0   :  { %7039 = vmatmul.mubr.msk.f32.gmra.mrb[80].mxu0 %vm64_vm0, %v6037_v12 }
 0x8b3   :  { %v5979_v51 = vpop.xlane.xlu1 %5978 }
 0x8b4   :  { %v5987_v11 = vmul.f32 0.03125, %v5979_v51  ;;  %v5976_v42 = vpop.xlane.xlu0 %5975 }
 0x8b5   :  { %v5986_v27 = vmul.f32 0.03125, %v5976_v42 }
 0x8b6   :  { %v5995_v0 = vadd.f32 1e-05, %v5987_v11 }
 0x8b7   :  { %v5994_v19 = vadd.f32 1e-05, %v5986_v27 }
 0x8b8   :  { %7313 = vrsqrt.f32 %v5995_v0 }
 0x8b9   :  { %7315 = vrsqrt.f32 %v5994_v19 }
 0x8c2   :  { %v7314_v25 = vpop.eup %7313 }
 0x8c3   :  { %v7316_v44 = vpop.eup %7315  ;;  %v6011_v21 = vmul.f32 %v7314_v25, %v8693_v13  ;;  %v6466_v13 = vld [vmem:[#allocation2] ss:$0 sm:$0xff] }
 0x8c4   :  { %v6010_v20 = vmul.f32 %v7316_v44, %v8696_v52 }
 0x8c5   :  { %v6025_v30 = vmul.f32 %v6464_v26, %v6011_v21 }
 0x8c6   :  { %v6024_v7 = vmul.f32 %v6464_v26, %v6010_v20 }
 0x8c7   :  { %v6039_v60 = vadd.f32 %v6465_v3, %v6025_v30 }
 0x8c8   :  { %v6038_v33 = vadd.f32 %v6465_v3, %v6024_v7 }
 0x8ca   :  { %7041 = vmatprep.mubr.msk.f32.mxu0 %vm64_vm0, %v6038_v33 }
 0x8cb   :  { %7042 = vmatmul.mubr.msk.f32.gmra.mrb[82].mxu0 %vm64_vm0, %v6039_v60 }
 0x976   :  { %v7034_v52 = vpop.f32.mrb[76].mxu0 }
 0x977   :  { %v6147_v28 = vadd.f32 %v7034_v52, %v6466_v13  ;;  %v6141_v63 = vpop.f32.mrb[77].mxu0 }
 0x978   :  { %v6142_v8 = vadd.f32 %v6466_v13, %v6141_v63 }
 0x979   :  { %v6181_v1 = vmax.f32 %v6147_v28, 0.0 }
 0x97a   :  { %v6180_v59 = vmax.f32 %v6142_v8, 0.0 }
 0x97c   :  { %7076 = vmatprep.mubr.f32.mxu1 %v6180_v59 }
 0x97d   :  { %7077 = vmatmul.mubr.f32.vlgmr.msra.gmra.mrb[68].mxu1 %v6181_v1 }
 0x97f   :  { %v7037_v4 = vpop.f32.mrb[78].mxu0 }
 0x980   :  { %v6157_v31 = vadd.f32 %v7037_v4, %v6466_v13  ;;  %v6151_v22 = vpop.f32.mrb[79].mxu0 }
 0x981   :  { %v6152_v49 = vadd.f32 %v6466_v13, %v6151_v22 }
 0x982   :  { %v6183_v26 = vmax.f32 %v6157_v31, 0.0 }
 0x983   :  { %v6182_v37 = vmax.f32 %v6152_v49, 0.0  ;;  %v7040_v29 = vpop.f32.mrb[80].mxu0 }
 0x984   :  { %v6167_v61 = vadd.f32 %v7040_v29, %v6466_v13  ;;  %v6161_v62 = vpop.f32.mrb[81].mxu0 }
 0x985   :  { %v6162_v34 = vadd.f32 %v6466_v13, %v6161_v62  ;;  %7079 = vmatprep.mubr.f32.mxu1 %v6182_v37 }
 0x986   :  { %7080 = vmatmul.mubr.f32.gmra.mrb[70].mxu1 %v6183_v26  ;;  %v6185_v3 = vmax.f32 %v6167_v61, 0.0 }
 0x987   :  { %v6184_v23 = vmax.f32 %v6162_v34, 0.0 }
 0x989   :  { %7082 = vmatprep.mubr.f32.mxu1 %v6184_v23 }
 0x98a   :  { %7083 = vmatmul.mubr.f32.gmra.mrb[72].mxu1 %v6185_v3 }
 0x99e   :  { %v7043_v9 = vpop.f32.mrb[82].mxu0 }
 0x99f   :  { %v6177_v46 = vadd.f32 %v7043_v9, %v6466_v13  ;;  %v6171_v15 = vpop.f32.mrb[83].mxu0 }
 0x9a0   :  { %v6172_v36 = vadd.f32 %v6466_v13, %v6171_v15 }
 0x9a1   :  { %v6187_v6 = vmax.f32 %v6177_v46, 0.0 }
 0x9a2   :  { %v6186_v48 = vmax.f32 %v6172_v36, 0.0 }
 0x9a4   :  { %7085 = vmatprep.mubr.f32.mxu1 %v6186_v48 }
 0x9a5   :  { %7086 = vmatmul.mubr.f32.gmra.mrb[74].mxu1 %v6187_v6 }
 0xa50   :  { %v7078_v5 = vpop.f32.mrb[68].mxu1 }
 0xa51   :  { %v6283_v14 = vadd.f32 %v7078_v5, %v6475_v40  ;;  %v6277_v18 = vpop.f32.mrb[69].mxu1 }
 0xa52   :  { %v6278_v58 = vadd.f32 %v6475_v40, %v6277_v18 }
 0xa53   :  { %v6317_v57 = vadd.f32 %v6283_v14, %v8591_v43 }
 0xa54   :  { %v6316_v41 = vadd.f32 %v6278_v58, %v8596_v32 }
 0xa55   :  { %6325 = vst.msk [vmem:[#allocation5 + $0x8] sm:$0xff] %vm64_vm0, %v6317_v57 }
 0xa56   :  { %6324 = vst.msk [vmem:[#allocation5] sm:$0xff] %vm64_vm0, %v6316_v41 }
 0xa59   :  { %v7081_v54 = vpop.f32.mrb[70].mxu1 }
 0xa5a   :  { %v6293_v50 = vadd.f32 %v7081_v54, %v6475_v40  ;;  %v6287_v2 = vpop.f32.mrb[71].mxu1 }
 0xa5b   :  { %v6288_v56 = vadd.f32 %v6475_v40, %v6287_v2 }
 0xa5c   :  { %v6319_v35 = vadd.f32 %v6293_v50, %v8605_v24 }
 0xa5d   :  { %v6318_v55 = vadd.f32 %v6288_v56, %v8612_v45  ;;  %v7084_v12 = vpop.f32.mrb[72].mxu1 }
 0xa5e   :  { %6327 = vst.msk [vmem:[#allocation5 + $0x18] sm:$0xff] %vm64_vm0, %v6319_v35  ;;  %v6303_v51 = vadd.f32 %v7084_v12, %v6475_v40  ;;  %v6297_v11 = vpop.f32.mrb[73].mxu1 }
 0xa5f   :  { %6326 = vst.msk [vmem:[#allocation5 + $0x10] sm:$0xff] %vm64_vm0, %v6318_v55  ;;  %v6298_v43 = vadd.f32 %v6475_v40, %v6297_v11 }
 0xa60   :  { %v6321_v32 = vadd.f32 %v6303_v51, %v8617_v39 }
 0xa61   :  { %v6320_v42 = vadd.f32 %v6298_v43, %v8624_v17 }
 0xa62   :  { %6329 = vst.msk [vmem:[#allocation5 + $0x28] sm:$0xff] %vm64_vm0, %v6321_v32 }
 0xa63   :  { %6328 = vst.msk [vmem:[#allocation5 + $0x20] sm:$0xff] %vm64_vm0, %v6320_v42 }
 0xa78   :  { %v7087_v27 = vpop.f32.mrb[74].mxu1 }
 0xa79   :  { %v6313_v24 = vadd.f32 %v7087_v27, %v6475_v40  ;;  %v6307_v0 = vpop.f32.mrb[75].mxu1 }
 0xa7a   :  { %v6308_v45 = vadd.f32 %v6475_v40, %v6307_v0 }
 0xa7b   :  { %v6323_v19 = vadd.f32 %v6313_v24, %v8633_v47 }
 0xa7c   :  { %v6322_v25 = vadd.f32 %v6308_v45, %v8638_v16 }
 0xa7d   :  { %6331 = vst.msk [vmem:[#allocation5 + $0x38] sm:$0xff] %vm64_vm0, %v6323_v19 }
 0xa7e   :  { %6330 = vst.msk [vmem:[#allocation5 + $0x30] sm:$0xff] %vm64_vm0, %v6322_v25 }
 0xa7f   :  { %7358 = shalt.err (!%p7355_p12)
}
 0xa80   :  { %s7359_s29 = scalar_lea.hbm %s8818_s12, 1024 }
 0xa81   :  { %p7360_p13 = scmp.ne.s32.totalorder %s8818_s12, %s7359_s29  ;;  %p7363_p0 = scmp.lt.u32.totalorder %s7359_s29, %s8818_s12 }
 0xa83   :  { %p7365_p1 = pnand %p7363_p0, %p7360_p13 }
 0xa85   :  { %7368 = shalt.err (!%p7365_p1)
}
 0xa86   :  { %s7385_s15 = smov 128  }
 0xa87   :  { %6343 = dma.vmem_to_hbm [thread:$0]  %s6338_s24, 1024, %s8818_s12, [#allocation4], %s7385_s15, %s7385_s15, %s7381_s26  }
 0xa88   :  { %7371 = dma.done.wait [#allocation4], 1024  }
 0xa89   :  { %7372 = vsyncadd [#allocation4], 4294966272 }
 0xa8a   :  { %6347 = vsyncpa [#allocation3], 1 }
 0xa8b   :  { %6348 = vsyncpa [#allocation4], 1 }

</bundles_post_ra>
